<compile_context>
chip_gen: v7x
topology: tpu7x:2x2x1
jax: 0.10.0
libtpu: 0.0.40
codegen_flags: <defaults>
</compile_context>

<pallas_src>
import jax
import jax.numpy as jnp
from jax.experimental import pallas as pl
from jax.experimental.pallas import tpu as pltpu

# ----------------------------- model hyperparams (scaled-down BEATs) --------
BATCH       = 2
N_FRAMES    = 64          # fbank time frames
N_MELS      = 32          # fbank mel bins
PATCH       = 16          # patch-embedding conv kernel == stride
EMBED       = 32          # encoder_embed_dim
HEADS       = 4
HDIM        = EMBED // HEADS
FFN         = 64
NUM_LAYERS  = 2
NUM_CLASS   = 50
CONV_POS    = 4           # positional conv kernel (even -> SamePad drops last)
CONV_GROUPS = 4
CONV_PAD    = CONV_POS // 2
FBANK_MEAN  = 15.41663
FBANK_STD   = 6.55582

N_TOKENS  = (N_FRAMES // PATCH) * (N_MELS // PATCH)   # 8 tokens
PATCH_DIM = PATCH * PATCH                             # 256
FC_PAD    = 128                                       # lane-dense fc output


def _gelu(x):
    return jax.nn.gelu(x, approximate=True)


def _layernorm(x, gb):
    g = gb[0:1, :]
    b = gb[1:2, :]
    mu = jnp.mean(x, axis=-1, keepdims=True)
    var = jnp.mean((x - mu) ** 2, axis=-1, keepdims=True)
    return (x - mu) * jax.lax.rsqrt(var + 1e-5) * g + b


# ----------------------------- the fused kernel ------------------------------
def _fused_forward_kernel(
        patches_ref, patch_w_ref, patch_b_ref, ln0_ref,
        pos_w_ref, pos_b_ref, enc_ln_ref,
        wqkv_ref, bqkv_ref, wo_ref, bo_ref, ln1_ref,
        w1_ref, b1_ref, w2_ref, b2_ref, ln2_ref,
        fc_w_ref, fc_b_ref, out_ref):
    """Entire MyBeatsModel forward for one batch element, resident in VMEM."""
    f32 = jnp.float32

    # ---- patch embedding (Conv2d stride==kernel == matmul).
    # fbank normalization is folded into patch_w/patch_b at pack time.
    p = patches_ref[0]                                   # (N_TOKENS, PATCH_DIM)
    x = jnp.dot(p, patch_w_ref[...], preferred_element_type=f32) + patch_b_ref[...]
    x = _layernorm(x, ln0_ref[...])

    # ---- positional grouped conv: one K=128 matmul over concatenated taps.
    zpad = jnp.zeros((CONV_PAD, EMBED), f32)
    xp = jnp.concatenate([zpad, x, zpad], axis=0)        # (N_TOKENS + 2*pad, D)
    xcat = jnp.concatenate([xp[j:j + N_TOKENS, :] for j in range(CONV_POS)],
                           axis=-1)                      # (N_TOKENS, K*D)
    pos = jnp.dot(xcat, pos_w_ref[...], preferred_element_type=f32)
    pos = _gelu(pos + pos_b_ref[...])
    x = _layernorm(x + pos, enc_ln_ref[...])

    # ---- transformer encoder layers (post-LN), fully unrolled in-kernel.
    for l in range(NUM_LAYERS):
        # fused QKV projection: one (N, D) x (D, 3D) matmul.
        # attention scale is pre-folded into Wq/bq at pack time.
        qkv = jnp.dot(x, wqkv_ref[l], preferred_element_type=f32) + bqkv_ref[l]
        q = qkv[:, 0 * EMBED:1 * EMBED]
        k = qkv[:, 1 * EMBED:2 * EMBED]
        v = qkv[:, 2 * EMBED:3 * EMBED]

        heads = []
        for h in range(HEADS):
            qh = q[:, h * HDIM:(h + 1) * HDIM]
            kh = k[:, h * HDIM:(h + 1) * HDIM]
            vh = v[:, h * HDIM:(h + 1) * HDIM]
            s = jax.lax.dot_general(qh, kh, (((1,), (1,)), ((), ())),
                                    preferred_element_type=f32)      # (N, N)
            s = s - jnp.max(s, axis=-1, keepdims=True)
            pr = jnp.exp(s)
            pr = pr * pl.reciprocal(jnp.sum(pr, axis=-1, keepdims=True),
                                    approx=True)
            heads.append(jnp.dot(pr, vh, preferred_element_type=f32))
        ctx = jnp.concatenate(heads, axis=-1)            # (N_TOKENS, EMBED)

        attn_out = (jnp.dot(ctx, wo_ref[l], preferred_element_type=f32)
                    + bo_ref[l])
        x = _layernorm(x + attn_out, ln1_ref[l])         # residual + LN fused

        hid = _gelu(jnp.dot(x, w1_ref[l], preferred_element_type=f32)
                    + b1_ref[l])
        hid = jnp.dot(hid, w2_ref[l], preferred_element_type=f32) + b2_ref[l]
        x = _layernorm(x + hid, ln2_ref[l])              # residual + LN fused

    # ---- fc + mean over time: mean first (linearity), then one tiny matmul.
    # fc weights are lane-padded to 128 so the store below is unmasked.
    x_mean = jnp.mean(x, axis=0, keepdims=True)          # (1, EMBED)
    out = (jnp.dot(x_mean, fc_w_ref[...], preferred_element_type=f32)
           + fc_b_ref[...])                              # (1, FC_PAD)
    out_ref[0] = out


# ----------------------------- parameters -----------------------------------
def init_params(key):
    keys = iter(jax.random.split(key, 8 + 8 * NUM_LAYERS))

    def nrm(shape, std=0.02):
        return std * jax.random.normal(next(keys), shape, jnp.float32)

    params = {
        "patch_w": nrm((PATCH_DIM, EMBED)),
        "patch_b": jnp.zeros((EMBED,), jnp.float32),
        "ln0_g": jnp.ones((EMBED,), jnp.float32),
        "ln0_b": jnp.zeros((EMBED,), jnp.float32),
        "pos_w": nrm((EMBED, EMBED // CONV_GROUPS, CONV_POS)),
        "pos_b": jnp.zeros((EMBED,), jnp.float32),
        "enc_ln_g": jnp.ones((EMBED,), jnp.float32),
        "enc_ln_b": jnp.zeros((EMBED,), jnp.float32),
        "fc_w": nrm((EMBED, NUM_CLASS)),
        "fc_b": jnp.zeros((NUM_CLASS,), jnp.float32),
        "layers": [],
    }
    for _ in range(NUM_LAYERS):
        params["layers"].append({
            "wq": nrm((EMBED, EMBED)), "bq": jnp.zeros((EMBED,), jnp.float32),
            "wk": nrm((EMBED, EMBED)), "bk": jnp.zeros((EMBED,), jnp.float32),
            "wv": nrm((EMBED, EMBED)), "bv": jnp.zeros((EMBED,), jnp.float32),
            "wo": nrm((EMBED, EMBED)), "bo": jnp.zeros((EMBED,), jnp.float32),
            "ln1_g": jnp.ones((EMBED,), jnp.float32),
            "ln1_b": jnp.zeros((EMBED,), jnp.float32),
            "w1": nrm((EMBED, FFN)), "b1": jnp.zeros((FFN,), jnp.float32),
            "w2": nrm((FFN, EMBED)), "b2": jnp.zeros((EMBED,), jnp.float32),
            "ln2_g": jnp.ones((EMBED,), jnp.float32),
            "ln2_b": jnp.zeros((EMBED,), jnp.float32),
        })
    return params


def pack_params(params):
    """One-time packing into kernel-friendly layouts (done outside jit)."""
    D, cg, L = EMBED, EMBED // CONV_GROUPS, params["layers"]

    # fbank normalization (x - mean) / (2*std) folded into patch embed.
    inv = 1.0 / (2.0 * FBANK_STD)
    patch_w = params["patch_w"] * inv
    patch_b = (params["patch_b"]
               - (FBANK_MEAN * inv) * jnp.sum(params["patch_w"], axis=0))

    # Grouped positional conv -> block-diagonal, pre-transposed per-tap (D, D)
    # matrices, then flattened to one (CONV_POS*D, D) matrix so the kernel
    # does a single K=128 matmul over the concatenated shifted taps.
    pos_w = params["pos_w"]                              # (D, D//G, K)
    pos_wp = jnp.zeros((CONV_POS, D, D), jnp.float32)
    for j in range(CONV_POS):
        for gi in range(CONV_GROUPS):
            blk = pos_w[gi * cg:(gi + 1) * cg, :, j].T   # (cg_in, cg_out)
            pos_wp = pos_wp.at[j, gi * cg:(gi + 1) * cg,
                               gi * cg:(gi + 1) * cg].set(blk)
    pos_w_cat = pos_wp.reshape(CONV_POS * D, D)

    # Attention scale folded into Wq / bq.
    scale = float(HDIM) ** -0.5

    # Lane-dense (128-wide, zero-padded) fc weights/bias.
    fc_w_pad = jnp.zeros((D, FC_PAD), jnp.float32).at[:, :NUM_CLASS].set(
        params["fc_w"])
    fc_b_pad = jnp.zeros((1, FC_PAD), jnp.float32).at[0, :NUM_CLASS].set(
        params["fc_b"])

    packed = {
        "patch_w": patch_w,
        "patch_b": patch_b.reshape(1, D),
        "ln0": jnp.stack([params["ln0_g"], params["ln0_b"]]),
        "pos_w": pos_w_cat,
        "pos_b": params["pos_b"].reshape(1, D),
        "enc_ln": jnp.stack([params["enc_ln_g"], params["enc_ln_b"]]),
        "wqkv": jnp.stack([jnp.concatenate(
            [lp["wq"] * scale, lp["wk"], lp["wv"]], axis=1) for lp in L]),
        "bqkv": jnp.stack([jnp.concatenate(
            [lp["bq"] * scale, lp["bk"], lp["bv"]])[None, :] for lp in L]),
        "wo": jnp.stack([lp["wo"] for lp in L]),
        "bo": jnp.stack([lp["bo"][None, :] for lp in L]),
        "ln1": jnp.stack([jnp.stack([lp["ln1_g"], lp["ln1_b"]]) for lp in L]),
        "w1": jnp.stack([lp["w1"] for lp in L]),
        "b1": jnp.stack([lp["b1"][None, :] for lp in L]),
        "w2": jnp.stack([lp["w2"] for lp in L]),
        "b2": jnp.stack([lp["b2"][None, :] for lp in L]),
        "ln2": jnp.stack([jnp.stack([lp["ln2_g"], lp["ln2_b"]]) for lp in L]),
        "fc_w": fc_w_pad,
        "fc_b": fc_b_pad,
    }
    return packed


# ----------------------------- forward pass ----------------------------------
def forward(packed, fbank):
    B, T, F = fbank.shape
    nT, nF = T // PATCH, F // PATCH
    n_tok = nT * nF

    # Patch extraction is pure layout plumbing; done once as XLA glue so the
    # kernel sees a lane-dense (n_tok, PATCH*PATCH) slab per batch element.
    patches = (fbank.reshape(B, nT, PATCH, nF, PATCH)
               .transpose(0, 1, 3, 2, 4)
               .reshape(B, n_tok, PATCH_DIM))

    out3 = pl.pallas_call(
        _fused_forward_kernel,
        out_shape=jax.ShapeDtypeStruct((B, 1, FC_PAD), jnp.float32),
        grid=(B,),
        in_specs=[
            pl.BlockSpec((1, n_tok, PATCH_DIM), lambda b: (b, 0, 0)),
            pl.BlockSpec((PATCH_DIM, EMBED), lambda b: (0, 0)),
            pl.BlockSpec((1, EMBED), lambda b: (0, 0)),
            pl.BlockSpec((2, EMBED), lambda b: (0, 0)),
            pl.BlockSpec((CONV_POS * EMBED, EMBED), lambda b: (0, 0)),
            pl.BlockSpec((1, EMBED), lambda b: (0, 0)),
            pl.BlockSpec((2, EMBED), lambda b: (0, 0)),
            pl.BlockSpec((NUM_LAYERS, EMBED, 3 * EMBED), lambda b: (0, 0, 0)),
            pl.BlockSpec((NUM_LAYERS, 1, 3 * EMBED), lambda b: (0, 0, 0)),
            pl.BlockSpec((NUM_LAYERS, EMBED, EMBED), lambda b: (0, 0, 0)),
            pl.BlockSpec((NUM_LAYERS, 1, EMBED), lambda b: (0, 0, 0)),
            pl.BlockSpec((NUM_LAYERS, 2, EMBED), lambda b: (0, 0, 0)),
            pl.BlockSpec((NUM_LAYERS, EMBED, FFN), lambda b: (0, 0, 0)),
            pl.BlockSpec((NUM_LAYERS, 1, FFN), lambda b: (0, 0, 0)),
            pl.BlockSpec((NUM_LAYERS, FFN, EMBED), lambda b: (0, 0, 0)),
            pl.BlockSpec((NUM_LAYERS, 1, EMBED), lambda b: (0, 0, 0)),
            pl.BlockSpec((NUM_LAYERS, 2, EMBED), lambda b: (0, 0, 0)),
            pl.BlockSpec((EMBED, FC_PAD), lambda b: (0, 0)),
            pl.BlockSpec((1, FC_PAD), lambda b: (0, 0)),
        ],
        out_specs=pl.BlockSpec((1, 1, FC_PAD), lambda b: (b, 0, 0)),
        compiler_params=pltpu.CompilerParams(
            dimension_semantics=("parallel",)),
    )(patches,
      packed["patch_w"], packed["patch_b"], packed["ln0"],
      packed["pos_w"], packed["pos_b"], packed["enc_ln"],
      packed["wqkv"], packed["bqkv"], packed["wo"], packed["bo"], packed["ln1"],
      packed["w1"], packed["b1"], packed["w2"], packed["b2"], packed["ln2"],
      packed["fc_w"], packed["fc_b"])
    # Slice the lane-padded class dim back to NUM_CLASS (cheap XLA slice).
    return out3[:, 0, :NUM_CLASS]


# ----------------------------- main ------------------------------------------
if __name__ == "__main__":
    key = jax.random.PRNGKey(0)
    pkey, xkey = jax.random.split(key)
    params = init_params(pkey)
    packed = pack_params(params)          # one-time weight packing, outside jit

    # Deterministic synthetic fbank input (roughly fbank-scaled).
    x_fbank = (jax.random.normal(xkey, (BATCH, N_FRAMES, N_MELS), jnp.float32)
               * FBANK_STD + FBANK_MEAN)

    out = jax.jit(forward)(packed, x_fbank)
    out = jax.block_until_ready(out)
    assert out.shape == (BATCH, NUM_CLASS)
    assert bool(jnp.all(jnp.isfinite(out)))
    print("KERNEL_OK")
</pallas_src>

<mosaic_0001>
module attributes {stable_mosaic.version = 11 : i64} {
  func.func @_fused_forward_kernel(%arg0: i32, %arg1: memref<1x8x256xf32, #tpu.memory_space<vmem>>, %arg2: memref<256x32xf32, #tpu.memory_space<vmem>>, %arg3: memref<1x32xf32, #tpu.memory_space<vmem>>, %arg4: memref<2x32xf32, #tpu.memory_space<vmem>>, %arg5: memref<128x32xf32, #tpu.memory_space<vmem>>, %arg6: memref<1x32xf32, #tpu.memory_space<vmem>>, %arg7: memref<2x32xf32, #tpu.memory_space<vmem>>, %arg8: memref<2x32x96xf32, #tpu.memory_space<vmem>>, %arg9: memref<2x1x96xf32, #tpu.memory_space<vmem>>, %arg10: memref<2x32x32xf32, #tpu.memory_space<vmem>>, %arg11: memref<2x1x32xf32, #tpu.memory_space<vmem>>, %arg12: memref<2x2x32xf32, #tpu.memory_space<vmem>>, %arg13: memref<2x32x64xf32, #tpu.memory_space<vmem>>, %arg14: memref<2x1x64xf32, #tpu.memory_space<vmem>>, %arg15: memref<2x64x32xf32, #tpu.memory_space<vmem>>, %arg16: memref<2x1x32xf32, #tpu.memory_space<vmem>>, %arg17: memref<2x2x32xf32, #tpu.memory_space<vmem>>, %arg18: memref<32x128xf32, #tpu.memory_space<vmem>>, %arg19: memref<1x128xf32, #tpu.memory_space<vmem>>, %arg20: memref<1x1x128xf32, #tpu.memory_space<vmem>>) attributes {dimension_semantics = [#tpu.dimension_semantics<parallel>], iteration_bounds = array<i64: 2>, scalar_prefetch = 0 : i64, scratch_operands = 0 : i64, tpu.core_type = #tpu.core_type<tc>, window_params = [{transform_indices = @transform_0, window_bounds = array<i64: 1, 8, 256>}, {pipeline_mode = #tpu.pipeline_mode<synchronous>, transform_indices = @transform_1, window_bounds = array<i64: 256, 32>}, {pipeline_mode = #tpu.pipeline_mode<synchronous>, transform_indices = @transform_2, window_bounds = array<i64: 1, 32>}, {pipeline_mode = #tpu.pipeline_mode<synchronous>, transform_indices = @transform_3, window_bounds = array<i64: 2, 32>}, {pipeline_mode = #tpu.pipeline_mode<synchronous>, transform_indices = @transform_4, window_bounds = array<i64: 128, 32>}, {pipeline_mode = #tpu.pipeline_mode<synchronous>, transform_indices = @transform_5, window_bounds = array<i64: 1, 32>}, {pipeline_mode = #tpu.pipeline_mode<synchronous>, transform_indices = @transform_6, window_bounds = array<i64: 2, 32>}, {pipeline_mode = #tpu.pipeline_mode<synchronous>, transform_indices = @transform_7, window_bounds = array<i64: 2, 32, 96>}, {pipeline_mode = #tpu.pipeline_mode<synchronous>, transform_indices = @transform_8, window_bounds = array<i64: 2, 1, 96>}, {pipeline_mode = #tpu.pipeline_mode<synchronous>, transform_indices = @transform_9, window_bounds = array<i64: 2, 32, 32>}, {pipeline_mode = #tpu.pipeline_mode<synchronous>, transform_indices = @transform_10, window_bounds = array<i64: 2, 1, 32>}, {pipeline_mode = #tpu.pipeline_mode<synchronous>, transform_indices = @transform_11, window_bounds = array<i64: 2, 2, 32>}, {pipeline_mode = #tpu.pipeline_mode<synchronous>, transform_indices = @transform_12, window_bounds = array<i64: 2, 32, 64>}, {pipeline_mode = #tpu.pipeline_mode<synchronous>, transform_indices = @transform_13, window_bounds = array<i64: 2, 1, 64>}, {pipeline_mode = #tpu.pipeline_mode<synchronous>, transform_indices = @transform_14, window_bounds = array<i64: 2, 64, 32>}, {pipeline_mode = #tpu.pipeline_mode<synchronous>, transform_indices = @transform_15, window_bounds = array<i64: 2, 1, 32>}, {pipeline_mode = #tpu.pipeline_mode<synchronous>, transform_indices = @transform_16, window_bounds = array<i64: 2, 2, 32>}, {pipeline_mode = #tpu.pipeline_mode<synchronous>, transform_indices = @transform_17, window_bounds = array<i64: 32, 128>}, {pipeline_mode = #tpu.pipeline_mode<synchronous>, transform_indices = @transform_18, window_bounds = array<i64: 1, 128>}, {transform_indices = @transform_19, window_bounds = array<i64: 1, 1, 128>}]} {
    %c0 = arith.constant 0 : index
    %c0_0 = arith.constant 0 : index
    %c0_1 = arith.constant 0 : index
    %0 = vector.load %arg1[%c0, %c0_0, %c0_1] : memref<1x8x256xf32, #tpu.memory_space<vmem>>, vector<1x8x256xf32>
    %1 = vector.shape_cast %0 : vector<1x8x256xf32> to vector<8x256xf32>
    %c0_2 = arith.constant 0 : index
    %c0_3 = arith.constant 0 : index
    %2 = vector.load %arg2[%c0_2, %c0_3] : memref<256x32xf32, #tpu.memory_space<vmem>>, vector<256x32xf32>
    %cst = arith.constant dense<0.000000e+00> : vector<8x32xf32>
    %3 = tpu.matmul %1, %2, %cst {dimension_numbers = #tpu.dot_dimension_numbers<[1], [0], [0], [1], [0, 0, 1, 1], [], []>} : vector<8x256xf32>, vector<256x32xf32>, vector<8x32xf32> -> vector<8x32xf32>
    %c0_4 = arith.constant 0 : index
    %c0_5 = arith.constant 0 : index
    %4 = vector.load %arg3[%c0_4, %c0_5] : memref<1x32xf32, #tpu.memory_space<vmem>>, vector<1x32xf32>
    %5 = vector.broadcast %4 : vector<1x32xf32> to vector<8x32xf32>
    %6 = arith.addf %3, %5 : vector<8x32xf32>
    %c0_6 = arith.constant 0 : index
    %c0_7 = arith.constant 0 : index
    %7 = vector.load %arg4[%c0_6, %c0_7] : memref<2x32xf32, #tpu.memory_space<vmem>>, vector<2x32xf32>
    %8 = vector.extract_strided_slice %7 {offsets = [0, 0], sizes = [1, 32], strides = [1, 1]} : vector<2x32xf32> to vector<1x32xf32>
    %9 = vector.extract_strided_slice %7 {offsets = [1, 0], sizes = [1, 32], strides = [1, 1]} : vector<2x32xf32> to vector<1x32xf32>
    %cst_8 = arith.constant dense<0.000000e+00> : vector<8xf32>
    %10 = vector.multi_reduction <add>, %6, %cst_8 [1] : vector<8x32xf32> to vector<8xf32>
    %11 = vector.shape_cast %10 : vector<8xf32> to vector<8x1xf32>
    %cst_9 = arith.constant 3.200000e+01 : f32
    %12 = vector.broadcast %cst_9 : f32 to vector<8x1xf32>
    %13 = arith.divf %11, %12 : vector<8x1xf32>
    %14 = vector.broadcast %13 : vector<8x1xf32> to vector<8x32xf32>
    %15 = arith.subf %6, %14 : vector<8x32xf32>
    %16 = arith.mulf %15, %15 : vector<8x32xf32>
    %cst_10 = arith.constant dense<0.000000e+00> : vector<8xf32>
    %17 = vector.multi_reduction <add>, %16, %cst_10 [1] : vector<8x32xf32> to vector<8xf32>
    %18 = vector.shape_cast %17 : vector<8xf32> to vector<8x1xf32>
    %cst_11 = arith.constant 3.200000e+01 : f32
    %19 = vector.broadcast %cst_11 : f32 to vector<8x1xf32>
    %20 = arith.divf %18, %19 : vector<8x1xf32>
    %21 = vector.broadcast %13 : vector<8x1xf32> to vector<8x32xf32>
    %22 = arith.subf %6, %21 : vector<8x32xf32>
    %cst_12 = arith.constant 9.99999974E-6 : f32
    %23 = vector.broadcast %cst_12 : f32 to vector<8x1xf32>
    %24 = arith.addf %20, %23 : vector<8x1xf32>
    %25 = math.rsqrt %24 : vector<8x1xf32>
    %26 = vector.broadcast %25 : vector<8x1xf32> to vector<8x32xf32>
    %27 = arith.mulf %22, %26 : vector<8x32xf32>
    %28 = vector.broadcast %8 : vector<1x32xf32> to vector<8x32xf32>
    %29 = arith.mulf %27, %28 : vector<8x32xf32>
    %30 = vector.broadcast %9 : vector<1x32xf32> to vector<8x32xf32>
    %31 = arith.addf %29, %30 : vector<8x32xf32>
    %cst_13 = arith.constant 0.000000e+00 : f32
    %32 = vector.broadcast %cst_13 : f32 to vector<2x32xf32>
    %33 = tpu.concatenate %32, %31, %32 in 0 : vector<2x32xf32>, vector<8x32xf32>, vector<2x32xf32> -> vector<12x32xf32>
    %34 = vector.extract_strided_slice %33 {offsets = [0, 0], sizes = [8, 32], strides = [1, 1]} : vector<12x32xf32> to vector<8x32xf32>
    %35 = vector.extract_strided_slice %33 {offsets = [1, 0], sizes = [8, 32], strides = [1, 1]} : vector<12x32xf32> to vector<8x32xf32>
    %36 = vector.extract_strided_slice %33 {offsets = [2, 0], sizes = [8, 32], strides = [1, 1]} : vector<12x32xf32> to vector<8x32xf32>
    %37 = vector.extract_strided_slice %33 {offsets = [3, 0], sizes = [8, 32], strides = [1, 1]} : vector<12x32xf32> to vector<8x32xf32>
    %38 = tpu.concatenate %34, %35, %36, %37 in 1 : vector<8x32xf32>, vector<8x32xf32>, vector<8x32xf32>, vector<8x32xf32> -> vector<8x128xf32>
    %c0_14 = arith.constant 0 : index
    %c0_15 = arith.constant 0 : index
    %39 = vector.load %arg5[%c0_14, %c0_15] : memref<128x32xf32, #tpu.memory_space<vmem>>, vector<128x32xf32>
    %cst_16 = arith.constant dense<0.000000e+00> : vector<8x32xf32>
    %40 = tpu.matmul %38, %39, %cst_16 {dimension_numbers = #tpu.dot_dimension_numbers<[1], [0], [0], [1], [0, 0, 1, 1], [], []>} : vector<8x128xf32>, vector<128x32xf32>, vector<8x32xf32> -> vector<8x32xf32>
    %c0_17 = arith.constant 0 : index
    %c0_18 = arith.constant 0 : index
    %41 = vector.load %arg6[%c0_17, %c0_18] : memref<1x32xf32, #tpu.memory_space<vmem>>, vector<1x32xf32>
    %42 = vector.broadcast %41 : vector<1x32xf32> to vector<8x32xf32>
    %43 = arith.addf %40, %42 : vector<8x32xf32>
    %44 = arith.mulf %43, %43 : vector<8x32xf32>
    %45 = arith.mulf %43, %44 : vector<8x32xf32>
    %cst_19 = arith.constant 4.471500e-02 : f32
    %46 = vector.broadcast %cst_19 : f32 to vector<8x32xf32>
    %47 = arith.mulf %46, %45 : vector<8x32xf32>
    %48 = arith.addf %43, %47 : vector<8x32xf32>
    %cst_20 = arith.constant 0.797884583 : f32
    %49 = vector.broadcast %cst_20 : f32 to vector<8x32xf32>
    %50 = arith.mulf %49, %48 : vector<8x32xf32>
    %51 = math.tanh %50 : vector<8x32xf32>
    %cst_21 = arith.constant 1.000000e+00 : f32
    %52 = vector.broadcast %cst_21 : f32 to vector<8x32xf32>
    %53 = arith.addf %52, %51 : vector<8x32xf32>
    %cst_22 = arith.constant 5.000000e-01 : f32
    %54 = vector.broadcast %cst_22 : f32 to vector<8x32xf32>
    %55 = arith.mulf %54, %53 : vector<8x32xf32>
    %56 = arith.mulf %43, %55 : vector<8x32xf32>
    %57 = arith.addf %31, %56 : vector<8x32xf32>
    %c0_23 = arith.constant 0 : index
    %c0_24 = arith.constant 0 : index
    %58 = vector.load %arg7[%c0_23, %c0_24] : memref<2x32xf32, #tpu.memory_space<vmem>>, vector<2x32xf32>
    %59 = vector.extract_strided_slice %58 {offsets = [0, 0], sizes = [1, 32], strides = [1, 1]} : vector<2x32xf32> to vector<1x32xf32>
    %60 = vector.extract_strided_slice %58 {offsets = [1, 0], sizes = [1, 32], strides = [1, 1]} : vector<2x32xf32> to vector<1x32xf32>
    %cst_25 = arith.constant dense<0.000000e+00> : vector<8xf32>
    %61 = vector.multi_reduction <add>, %57, %cst_25 [1] : vector<8x32xf32> to vector<8xf32>
    %62 = vector.shape_cast %61 : vector<8xf32> to vector<8x1xf32>
    %cst_26 = arith.constant 3.200000e+01 : f32
    %63 = vector.broadcast %cst_26 : f32 to vector<8x1xf32>
    %64 = arith.divf %62, %63 : vector<8x1xf32>
    %65 = vector.broadcast %64 : vector<8x1xf32> to vector<8x32xf32>
    %66 = arith.subf %57, %65 : vector<8x32xf32>
    %67 = arith.mulf %66, %66 : vector<8x32xf32>
    %cst_27 = arith.constant dense<0.000000e+00> : vector<8xf32>
    %68 = vector.multi_reduction <add>, %67, %cst_27 [1] : vector<8x32xf32> to vector<8xf32>
    %69 = vector.shape_cast %68 : vector<8xf32> to vector<8x1xf32>
    %cst_28 = arith.constant 3.200000e+01 : f32
    %70 = vector.broadcast %cst_28 : f32 to vector<8x1xf32>
    %71 = arith.divf %69, %70 : vector<8x1xf32>
    %72 = vector.broadcast %64 : vector<8x1xf32> to vector<8x32xf32>
    %73 = arith.subf %57, %72 : vector<8x32xf32>
    %cst_29 = arith.constant 9.99999974E-6 : f32
    %74 = vector.broadcast %cst_29 : f32 to vector<8x1xf32>
    %75 = arith.addf %71, %74 : vector<8x1xf32>
    %76 = math.rsqrt %75 : vector<8x1xf32>
    %77 = vector.broadcast %76 : vector<8x1xf32> to vector<8x32xf32>
    %78 = arith.mulf %73, %77 : vector<8x32xf32>
    %79 = vector.broadcast %59 : vector<1x32xf32> to vector<8x32xf32>
    %80 = arith.mulf %78, %79 : vector<8x32xf32>
    %81 = vector.broadcast %60 : vector<1x32xf32> to vector<8x32xf32>
    %82 = arith.addf %80, %81 : vector<8x32xf32>
    %c0_30 = arith.constant 0 : index
    %c0_31 = arith.constant 0 : index
    %c0_32 = arith.constant 0 : index
    %83 = vector.load %arg8[%c0_30, %c0_31, %c0_32] : memref<2x32x96xf32, #tpu.memory_space<vmem>>, vector<1x32x96xf32>
    %84 = vector.shape_cast %83 : vector<1x32x96xf32> to vector<32x96xf32>
    %cst_33 = arith.constant dense<0.000000e+00> : vector<8x96xf32>
    %85 = tpu.matmul %82, %84, %cst_33 {dimension_numbers = #tpu.dot_dimension_numbers<[1], [0], [0], [1], [0, 0, 1, 1], [], []>} : vector<8x32xf32>, vector<32x96xf32>, vector<8x96xf32> -> vector<8x96xf32>
    %c0_34 = arith.constant 0 : index
    %c0_35 = arith.constant 0 : index
    %c0_36 = arith.constant 0 : index
    %86 = vector.load %arg9[%c0_34, %c0_35, %c0_36] : memref<2x1x96xf32, #tpu.memory_space<vmem>>, vector<1x1x96xf32>
    %87 = vector.shape_cast %86 : vector<1x1x96xf32> to vector<1x96xf32>
    %88 = vector.broadcast %87 : vector<1x96xf32> to vector<8x96xf32>
    %89 = arith.addf %85, %88 : vector<8x96xf32>
    %90 = vector.extract_strided_slice %89 {offsets = [0, 0], sizes = [8, 32], strides = [1, 1]} : vector<8x96xf32> to vector<8x32xf32>
    %91 = vector.extract_strided_slice %89 {offsets = [0, 32], sizes = [8, 32], strides = [1, 1]} : vector<8x96xf32> to vector<8x32xf32>
    %92 = vector.extract_strided_slice %89 {offsets = [0, 64], sizes = [8, 32], strides = [1, 1]} : vector<8x96xf32> to vector<8x32xf32>
    %93 = vector.extract_strided_slice %90 {offsets = [0, 0], sizes = [8, 8], strides = [1, 1]} : vector<8x32xf32> to vector<8x8xf32>
    %94 = vector.extract_strided_slice %91 {offsets = [0, 0], sizes = [8, 8], strides = [1, 1]} : vector<8x32xf32> to vector<8x8xf32>
    %95 = vector.extract_strided_slice %92 {offsets = [0, 0], sizes = [8, 8], strides = [1, 1]} : vector<8x32xf32> to vector<8x8xf32>
    %cst_37 = arith.constant dense<0.000000e+00> : vector<8x8xf32>
    %96 = tpu.matmul %93, %94, %cst_37 {dimension_numbers = #tpu.dot_dimension_numbers<[1], [1], [0], [0], [0, 0, 1, 0], [], []>} : vector<8x8xf32>, vector<8x8xf32>, vector<8x8xf32> -> vector<8x8xf32>
    %cst_38 = arith.constant dense<0xFF800000> : vector<8xf32>
    %97 = vector.multi_reduction <maximumf>, %96, %cst_38 [1] : vector<8x8xf32> to vector<8xf32>
    %98 = vector.shape_cast %97 : vector<8xf32> to vector<8x1xf32>
    %99 = vector.broadcast %98 : vector<8x1xf32> to vector<8x8xf32>
    %100 = arith.subf %96, %99 : vector<8x8xf32>
    %101 = math.exp %100 : vector<8x8xf32>
    %cst_39 = arith.constant dense<0.000000e+00> : vector<8xf32>
    %102 = vector.multi_reduction <add>, %101, %cst_39 [1] : vector<8x8xf32> to vector<8xf32>
    %103 = vector.shape_cast %102 : vector<8xf32> to vector<8x1xf32>
    %104 = tpu.reciprocal %103 {approx = true} : vector<8x1xf32> -> vector<8x1xf32>
    %105 = vector.broadcast %104 : vector<8x1xf32> to vector<8x8xf32>
    %106 = arith.mulf %101, %105 : vector<8x8xf32>
    %cst_40 = arith.constant dense<0.000000e+00> : vector<8x8xf32>
    %107 = tpu.matmul %106, %95, %cst_40 {dimension_numbers = #tpu.dot_dimension_numbers<[1], [0], [0], [1], [0, 0, 1, 1], [], []>} : vector<8x8xf32>, vector<8x8xf32>, vector<8x8xf32> -> vector<8x8xf32>
    %108 = vector.extract_strided_slice %90 {offsets = [0, 8], sizes = [8, 8], strides = [1, 1]} : vector<8x32xf32> to vector<8x8xf32>
    %109 = vector.extract_strided_slice %91 {offsets = [0, 8], sizes = [8, 8], strides = [1, 1]} : vector<8x32xf32> to vector<8x8xf32>
    %110 = vector.extract_strided_slice %92 {offsets = [0, 8], sizes = [8, 8], strides = [1, 1]} : vector<8x32xf32> to vector<8x8xf32>
    %cst_41 = arith.constant dense<0.000000e+00> : vector<8x8xf32>
    %111 = tpu.matmul %108, %109, %cst_41 {dimension_numbers = #tpu.dot_dimension_numbers<[1], [1], [0], [0], [0, 0, 1, 0], [], []>} : vector<8x8xf32>, vector<8x8xf32>, vector<8x8xf32> -> vector<8x8xf32>
    %cst_42 = arith.constant dense<0xFF800000> : vector<8xf32>
    %112 = vector.multi_reduction <maximumf>, %111, %cst_42 [1] : vector<8x8xf32> to vector<8xf32>
    %113 = vector.shape_cast %112 : vector<8xf32> to vector<8x1xf32>
    %114 = vector.broadcast %113 : vector<8x1xf32> to vector<8x8xf32>
    %115 = arith.subf %111, %114 : vector<8x8xf32>
    %116 = math.exp %115 : vector<8x8xf32>
    %cst_43 = arith.constant dense<0.000000e+00> : vector<8xf32>
    %117 = vector.multi_reduction <add>, %116, %cst_43 [1] : vector<8x8xf32> to vector<8xf32>
    %118 = vector.shape_cast %117 : vector<8xf32> to vector<8x1xf32>
    %119 = tpu.reciprocal %118 {approx = true} : vector<8x1xf32> -> vector<8x1xf32>
    %120 = vector.broadcast %119 : vector<8x1xf32> to vector<8x8xf32>
    %121 = arith.mulf %116, %120 : vector<8x8xf32>
    %cst_44 = arith.constant dense<0.000000e+00> : vector<8x8xf32>
    %122 = tpu.matmul %121, %110, %cst_44 {dimension_numbers = #tpu.dot_dimension_numbers<[1], [0], [0], [1], [0, 0, 1, 1], [], []>} : vector<8x8xf32>, vector<8x8xf32>, vector<8x8xf32> -> vector<8x8xf32>
    %123 = vector.extract_strided_slice %90 {offsets = [0, 16], sizes = [8, 8], strides = [1, 1]} : vector<8x32xf32> to vector<8x8xf32>
    %124 = vector.extract_strided_slice %91 {offsets = [0, 16], sizes = [8, 8], strides = [1, 1]} : vector<8x32xf32> to vector<8x8xf32>
    %125 = vector.extract_strided_slice %92 {offsets = [0, 16], sizes = [8, 8], strides = [1, 1]} : vector<8x32xf32> to vector<8x8xf32>
    %cst_45 = arith.constant dense<0.000000e+00> : vector<8x8xf32>
    %126 = tpu.matmul %123, %124, %cst_45 {dimension_numbers = #tpu.dot_dimension_numbers<[1], [1], [0], [0], [0, 0, 1, 0], [], []>} : vector<8x8xf32>, vector<8x8xf32>, vector<8x8xf32> -> vector<8x8xf32>
    %cst_46 = arith.constant dense<0xFF800000> : vector<8xf32>
    %127 = vector.multi_reduction <maximumf>, %126, %cst_46 [1] : vector<8x8xf32> to vector<8xf32>
    %128 = vector.shape_cast %127 : vector<8xf32> to vector<8x1xf32>
    %129 = vector.broadcast %128 : vector<8x1xf32> to vector<8x8xf32>
    %130 = arith.subf %126, %129 : vector<8x8xf32>
    %131 = math.exp %130 : vector<8x8xf32>
    %cst_47 = arith.constant dense<0.000000e+00> : vector<8xf32>
    %132 = vector.multi_reduction <add>, %131, %cst_47 [1] : vector<8x8xf32> to vector<8xf32>
    %133 = vector.shape_cast %132 : vector<8xf32> to vector<8x1xf32>
    %134 = tpu.reciprocal %133 {approx = true} : vector<8x1xf32> -> vector<8x1xf32>
    %135 = vector.broadcast %134 : vector<8x1xf32> to vector<8x8xf32>
    %136 = arith.mulf %131, %135 : vector<8x8xf32>
    %cst_48 = arith.constant dense<0.000000e+00> : vector<8x8xf32>
    %137 = tpu.matmul %136, %125, %cst_48 {dimension_numbers = #tpu.dot_dimension_numbers<[1], [0], [0], [1], [0, 0, 1, 1], [], []>} : vector<8x8xf32>, vector<8x8xf32>, vector<8x8xf32> -> vector<8x8xf32>
    %138 = vector.extract_strided_slice %90 {offsets = [0, 24], sizes = [8, 8], strides = [1, 1]} : vector<8x32xf32> to vector<8x8xf32>
    %139 = vector.extract_strided_slice %91 {offsets = [0, 24], sizes = [8, 8], strides = [1, 1]} : vector<8x32xf32> to vector<8x8xf32>
    %140 = vector.extract_strided_slice %92 {offsets = [0, 24], sizes = [8, 8], strides = [1, 1]} : vector<8x32xf32> to vector<8x8xf32>
    %cst_49 = arith.constant dense<0.000000e+00> : vector<8x8xf32>
    %141 = tpu.matmul %138, %139, %cst_49 {dimension_numbers = #tpu.dot_dimension_numbers<[1], [1], [0], [0], [0, 0, 1, 0], [], []>} : vector<8x8xf32>, vector<8x8xf32>, vector<8x8xf32> -> vector<8x8xf32>
    %cst_50 = arith.constant dense<0xFF800000> : vector<8xf32>
    %142 = vector.multi_reduction <maximumf>, %141, %cst_50 [1] : vector<8x8xf32> to vector<8xf32>
    %143 = vector.shape_cast %142 : vector<8xf32> to vector<8x1xf32>
    %144 = vector.broadcast %143 : vector<8x1xf32> to vector<8x8xf32>
    %145 = arith.subf %141, %144 : vector<8x8xf32>
    %146 = math.exp %145 : vector<8x8xf32>
    %cst_51 = arith.constant dense<0.000000e+00> : vector<8xf32>
    %147 = vector.multi_reduction <add>, %146, %cst_51 [1] : vector<8x8xf32> to vector<8xf32>
    %148 = vector.shape_cast %147 : vector<8xf32> to vector<8x1xf32>
    %149 = tpu.reciprocal %148 {approx = true} : vector<8x1xf32> -> vector<8x1xf32>
    %150 = vector.broadcast %149 : vector<8x1xf32> to vector<8x8xf32>
    %151 = arith.mulf %146, %150 : vector<8x8xf32>
    %cst_52 = arith.constant dense<0.000000e+00> : vector<8x8xf32>
    %152 = tpu.matmul %151, %140, %cst_52 {dimension_numbers = #tpu.dot_dimension_numbers<[1], [0], [0], [1], [0, 0, 1, 1], [], []>} : vector<8x8xf32>, vector<8x8xf32>, vector<8x8xf32> -> vector<8x8xf32>
    %153 = tpu.concatenate %107, %122, %137, %152 in 1 : vector<8x8xf32>, vector<8x8xf32>, vector<8x8xf32>, vector<8x8xf32> -> vector<8x32xf32>
    %c0_53 = arith.constant 0 : index
    %c0_54 = arith.constant 0 : index
    %c0_55 = arith.constant 0 : index
    %154 = vector.load %arg10[%c0_53, %c0_54, %c0_55] : memref<2x32x32xf32, #tpu.memory_space<vmem>>, vector<1x32x32xf32>
    %155 = vector.shape_cast %154 : vector<1x32x32xf32> to vector<32x32xf32>
    %cst_56 = arith.constant dense<0.000000e+00> : vector<8x32xf32>
    %156 = tpu.matmul %153, %155, %cst_56 {dimension_numbers = #tpu.dot_dimension_numbers<[1], [0], [0], [1], [0, 0, 1, 1], [], []>} : vector<8x32xf32>, vector<32x32xf32>, vector<8x32xf32> -> vector<8x32xf32>
    %c0_57 = arith.constant 0 : index
    %c0_58 = arith.constant 0 : index
    %c0_59 = arith.constant 0 : index
    %157 = vector.load %arg11[%c0_57, %c0_58, %c0_59] : memref<2x1x32xf32, #tpu.memory_space<vmem>>, vector<1x1x32xf32>
    %158 = vector.shape_cast %157 : vector<1x1x32xf32> to vector<1x32xf32>
    %159 = vector.broadcast %158 : vector<1x32xf32> to vector<8x32xf32>
    %160 = arith.addf %156, %159 : vector<8x32xf32>
    %161 = arith.addf %82, %160 : vector<8x32xf32>
    %c0_60 = arith.constant 0 : index
    %c0_61 = arith.constant 0 : index
    %c0_62 = arith.constant 0 : index
    %162 = vector.load %arg12[%c0_60, %c0_61, %c0_62] : memref<2x2x32xf32, #tpu.memory_space<vmem>>, vector<1x2x32xf32>
    %163 = vector.shape_cast %162 : vector<1x2x32xf32> to vector<2x32xf32>
    %164 = vector.extract_strided_slice %163 {offsets = [0, 0], sizes = [1, 32], strides = [1, 1]} : vector<2x32xf32> to vector<1x32xf32>
    %165 = vector.extract_strided_slice %163 {offsets = [1, 0], sizes = [1, 32], strides = [1, 1]} : vector<2x32xf32> to vector<1x32xf32>
    %cst_63 = arith.constant dense<0.000000e+00> : vector<8xf32>
    %166 = vector.multi_reduction <add>, %161, %cst_63 [1] : vector<8x32xf32> to vector<8xf32>
    %167 = vector.shape_cast %166 : vector<8xf32> to vector<8x1xf32>
    %cst_64 = arith.constant 3.200000e+01 : f32
    %168 = vector.broadcast %cst_64 : f32 to vector<8x1xf32>
    %169 = arith.divf %167, %168 : vector<8x1xf32>
    %170 = vector.broadcast %169 : vector<8x1xf32> to vector<8x32xf32>
    %171 = arith.subf %161, %170 : vector<8x32xf32>
    %172 = arith.mulf %171, %171 : vector<8x32xf32>
    %cst_65 = arith.constant dense<0.000000e+00> : vector<8xf32>
    %173 = vector.multi_reduction <add>, %172, %cst_65 [1] : vector<8x32xf32> to vector<8xf32>
    %174 = vector.shape_cast %173 : vector<8xf32> to vector<8x1xf32>
    %cst_66 = arith.constant 3.200000e+01 : f32
    %175 = vector.broadcast %cst_66 : f32 to vector<8x1xf32>
    %176 = arith.divf %174, %175 : vector<8x1xf32>
    %177 = vector.broadcast %169 : vector<8x1xf32> to vector<8x32xf32>
    %178 = arith.subf %161, %177 : vector<8x32xf32>
    %cst_67 = arith.constant 9.99999974E-6 : f32
    %179 = vector.broadcast %cst_67 : f32 to vector<8x1xf32>
    %180 = arith.addf %176, %179 : vector<8x1xf32>
    %181 = math.rsqrt %180 : vector<8x1xf32>
    %182 = vector.broadcast %181 : vector<8x1xf32> to vector<8x32xf32>
    %183 = arith.mulf %178, %182 : vector<8x32xf32>
    %184 = vector.broadcast %164 : vector<1x32xf32> to vector<8x32xf32>
    %185 = arith.mulf %183, %184 : vector<8x32xf32>
    %186 = vector.broadcast %165 : vector<1x32xf32> to vector<8x32xf32>
    %187 = arith.addf %185, %186 : vector<8x32xf32>
    %c0_68 = arith.constant 0 : index
    %c0_69 = arith.constant 0 : index
    %c0_70 = arith.constant 0 : index
    %188 = vector.load %arg13[%c0_68, %c0_69, %c0_70] : memref<2x32x64xf32, #tpu.memory_space<vmem>>, vector<1x32x64xf32>
    %189 = vector.shape_cast %188 : vector<1x32x64xf32> to vector<32x64xf32>
    %cst_71 = arith.constant dense<0.000000e+00> : vector<8x64xf32>
    %190 = tpu.matmul %187, %189, %cst_71 {dimension_numbers = #tpu.dot_dimension_numbers<[1], [0], [0], [1], [0, 0, 1, 1], [], []>} : vector<8x32xf32>, vector<32x64xf32>, vector<8x64xf32> -> vector<8x64xf32>
    %c0_72 = arith.constant 0 : index
    %c0_73 = arith.constant 0 : index
    %c0_74 = arith.constant 0 : index
    %191 = vector.load %arg14[%c0_72, %c0_73, %c0_74] : memref<2x1x64xf32, #tpu.memory_space<vmem>>, vector<1x1x64xf32>
    %192 = vector.shape_cast %191 : vector<1x1x64xf32> to vector<1x64xf32>
    %193 = vector.broadcast %192 : vector<1x64xf32> to vector<8x64xf32>
    %194 = arith.addf %190, %193 : vector<8x64xf32>
    %195 = arith.mulf %194, %194 : vector<8x64xf32>
    %196 = arith.mulf %194, %195 : vector<8x64xf32>
    %cst_75 = arith.constant 4.471500e-02 : f32
    %197 = vector.broadcast %cst_75 : f32 to vector<8x64xf32>
    %198 = arith.mulf %197, %196 : vector<8x64xf32>
    %199 = arith.addf %194, %198 : vector<8x64xf32>
    %cst_76 = arith.constant 0.797884583 : f32
    %200 = vector.broadcast %cst_76 : f32 to vector<8x64xf32>
    %201 = arith.mulf %200, %199 : vector<8x64xf32>
    %202 = math.tanh %201 : vector<8x64xf32>
    %cst_77 = arith.constant 1.000000e+00 : f32
    %203 = vector.broadcast %cst_77 : f32 to vector<8x64xf32>
    %204 = arith.addf %203, %202 : vector<8x64xf32>
    %cst_78 = arith.constant 5.000000e-01 : f32
    %205 = vector.broadcast %cst_78 : f32 to vector<8x64xf32>
    %206 = arith.mulf %205, %204 : vector<8x64xf32>
    %207 = arith.mulf %194, %206 : vector<8x64xf32>
    %c0_79 = arith.constant 0 : index
    %c0_80 = arith.constant 0 : index
    %c0_81 = arith.constant 0 : index
    %208 = vector.load %arg15[%c0_79, %c0_80, %c0_81] : memref<2x64x32xf32, #tpu.memory_space<vmem>>, vector<1x64x32xf32>
    %209 = vector.shape_cast %208 : vector<1x64x32xf32> to vector<64x32xf32>
    %cst_82 = arith.constant dense<0.000000e+00> : vector<8x32xf32>
    %210 = tpu.matmul %207, %209, %cst_82 {dimension_numbers = #tpu.dot_dimension_numbers<[1], [0], [0], [1], [0, 0, 1, 1], [], []>} : vector<8x64xf32>, vector<64x32xf32>, vector<8x32xf32> -> vector<8x32xf32>
    %c0_83 = arith.constant 0 : index
    %c0_84 = arith.constant 0 : index
    %c0_85 = arith.constant 0 : index
    %211 = vector.load %arg16[%c0_83, %c0_84, %c0_85] : memref<2x1x32xf32, #tpu.memory_space<vmem>>, vector<1x1x32xf32>
    %212 = vector.shape_cast %211 : vector<1x1x32xf32> to vector<1x32xf32>
    %213 = vector.broadcast %212 : vector<1x32xf32> to vector<8x32xf32>
    %214 = arith.addf %210, %213 : vector<8x32xf32>
    %215 = arith.addf %187, %214 : vector<8x32xf32>
    %c0_86 = arith.constant 0 : index
    %c0_87 = arith.constant 0 : index
    %c0_88 = arith.constant 0 : index
    %216 = vector.load %arg17[%c0_86, %c0_87, %c0_88] : memref<2x2x32xf32, #tpu.memory_space<vmem>>, vector<1x2x32xf32>
    %217 = vector.shape_cast %216 : vector<1x2x32xf32> to vector<2x32xf32>
    %218 = vector.extract_strided_slice %217 {offsets = [0, 0], sizes = [1, 32], strides = [1, 1]} : vector<2x32xf32> to vector<1x32xf32>
    %219 = vector.extract_strided_slice %217 {offsets = [1, 0], sizes = [1, 32], strides = [1, 1]} : vector<2x32xf32> to vector<1x32xf32>
    %cst_89 = arith.constant dense<0.000000e+00> : vector<8xf32>
    %220 = vector.multi_reduction <add>, %215, %cst_89 [1] : vector<8x32xf32> to vector<8xf32>
    %221 = vector.shape_cast %220 : vector<8xf32> to vector<8x1xf32>
    %cst_90 = arith.constant 3.200000e+01 : f32
    %222 = vector.broadcast %cst_90 : f32 to vector<8x1xf32>
    %223 = arith.divf %221, %222 : vector<8x1xf32>
    %224 = vector.broadcast %223 : vector<8x1xf32> to vector<8x32xf32>
    %225 = arith.subf %215, %224 : vector<8x32xf32>
    %226 = arith.mulf %225, %225 : vector<8x32xf32>
    %cst_91 = arith.constant dense<0.000000e+00> : vector<8xf32>
    %227 = vector.multi_reduction <add>, %226, %cst_91 [1] : vector<8x32xf32> to vector<8xf32>
    %228 = vector.shape_cast %227 : vector<8xf32> to vector<8x1xf32>
    %cst_92 = arith.constant 3.200000e+01 : f32
    %229 = vector.broadcast %cst_92 : f32 to vector<8x1xf32>
    %230 = arith.divf %228, %229 : vector<8x1xf32>
    %231 = vector.broadcast %223 : vector<8x1xf32> to vector<8x32xf32>
    %232 = arith.subf %215, %231 : vector<8x32xf32>
    %cst_93 = arith.constant 9.99999974E-6 : f32
    %233 = vector.broadcast %cst_93 : f32 to vector<8x1xf32>
    %234 = arith.addf %230, %233 : vector<8x1xf32>
    %235 = math.rsqrt %234 : vector<8x1xf32>
    %236 = vector.broadcast %235 : vector<8x1xf32> to vector<8x32xf32>
    %237 = arith.mulf %232, %236 : vector<8x32xf32>
    %238 = vector.broadcast %218 : vector<1x32xf32> to vector<8x32xf32>
    %239 = arith.mulf %237, %238 : vector<8x32xf32>
    %240 = vector.broadcast %219 : vector<1x32xf32> to vector<8x32xf32>
    %241 = arith.addf %239, %240 : vector<8x32xf32>
    %c1 = arith.constant 1 : index
    %c0_94 = arith.constant 0 : index
    %c0_95 = arith.constant 0 : index
    %242 = vector.load %arg8[%c1, %c0_94, %c0_95] : memref<2x32x96xf32, #tpu.memory_space<vmem>>, vector<1x32x96xf32>
    %243 = vector.shape_cast %242 : vector<1x32x96xf32> to vector<32x96xf32>
    %cst_96 = arith.constant dense<0.000000e+00> : vector<8x96xf32>
    %244 = tpu.matmul %241, %243, %cst_96 {dimension_numbers = #tpu.dot_dimension_numbers<[1], [0], [0], [1], [0, 0, 1, 1], [], []>} : vector<8x32xf32>, vector<32x96xf32>, vector<8x96xf32> -> vector<8x96xf32>
    %c1_97 = arith.constant 1 : index
    %c0_98 = arith.constant 0 : index
    %c0_99 = arith.constant 0 : index
    %245 = vector.load %arg9[%c1_97, %c0_98, %c0_99] : memref<2x1x96xf32, #tpu.memory_space<vmem>>, vector<1x1x96xf32>
    %246 = vector.shape_cast %245 : vector<1x1x96xf32> to vector<1x96xf32>
    %247 = vector.broadcast %246 : vector<1x96xf32> to vector<8x96xf32>
    %248 = arith.addf %244, %247 : vector<8x96xf32>
    %249 = vector.extract_strided_slice %248 {offsets = [0, 0], sizes = [8, 32], strides = [1, 1]} : vector<8x96xf32> to vector<8x32xf32>
    %250 = vector.extract_strided_slice %248 {offsets = [0, 32], sizes = [8, 32], strides = [1, 1]} : vector<8x96xf32> to vector<8x32xf32>
    %251 = vector.extract_strided_slice %248 {offsets = [0, 64], sizes = [8, 32], strides = [1, 1]} : vector<8x96xf32> to vector<8x32xf32>
    %252 = vector.extract_strided_slice %249 {offsets = [0, 0], sizes = [8, 8], strides = [1, 1]} : vector<8x32xf32> to vector<8x8xf32>
    %253 = vector.extract_strided_slice %250 {offsets = [0, 0], sizes = [8, 8], strides = [1, 1]} : vector<8x32xf32> to vector<8x8xf32>
    %254 = vector.extract_strided_slice %251 {offsets = [0, 0], sizes = [8, 8], strides = [1, 1]} : vector<8x32xf32> to vector<8x8xf32>
    %cst_100 = arith.constant dense<0.000000e+00> : vector<8x8xf32>
    %255 = tpu.matmul %252, %253, %cst_100 {dimension_numbers = #tpu.dot_dimension_numbers<[1], [1], [0], [0], [0, 0, 1, 0], [], []>} : vector<8x8xf32>, vector<8x8xf32>, vector<8x8xf32> -> vector<8x8xf32>
    %cst_101 = arith.constant dense<0xFF800000> : vector<8xf32>
    %256 = vector.multi_reduction <maximumf>, %255, %cst_101 [1] : vector<8x8xf32> to vector<8xf32>
    %257 = vector.shape_cast %256 : vector<8xf32> to vector<8x1xf32>
    %258 = vector.broadcast %257 : vector<8x1xf32> to vector<8x8xf32>
    %259 = arith.subf %255, %258 : vector<8x8xf32>
    %260 = math.exp %259 : vector<8x8xf32>
    %cst_102 = arith.constant dense<0.000000e+00> : vector<8xf32>
    %261 = vector.multi_reduction <add>, %260, %cst_102 [1] : vector<8x8xf32> to vector<8xf32>
    %262 = vector.shape_cast %261 : vector<8xf32> to vector<8x1xf32>
    %263 = tpu.reciprocal %262 {approx = true} : vector<8x1xf32> -> vector<8x1xf32>
    %264 = vector.broadcast %263 : vector<8x1xf32> to vector<8x8xf32>
    %265 = arith.mulf %260, %264 : vector<8x8xf32>
    %cst_103 = arith.constant dense<0.000000e+00> : vector<8x8xf32>
    %266 = tpu.matmul %265, %254, %cst_103 {dimension_numbers = #tpu.dot_dimension_numbers<[1], [0], [0], [1], [0, 0, 1, 1], [], []>} : vector<8x8xf32>, vector<8x8xf32>, vector<8x8xf32> -> vector<8x8xf32>
    %267 = vector.extract_strided_slice %249 {offsets = [0, 8], sizes = [8, 8], strides = [1, 1]} : vector<8x32xf32> to vector<8x8xf32>
    %268 = vector.extract_strided_slice %250 {offsets = [0, 8], sizes = [8, 8], strides = [1, 1]} : vector<8x32xf32> to vector<8x8xf32>
    %269 = vector.extract_strided_slice %251 {offsets = [0, 8], sizes = [8, 8], strides = [1, 1]} : vector<8x32xf32> to vector<8x8xf32>
    %cst_104 = arith.constant dense<0.000000e+00> : vector<8x8xf32>
    %270 = tpu.matmul %267, %268, %cst_104 {dimension_numbers = #tpu.dot_dimension_numbers<[1], [1], [0], [0], [0, 0, 1, 0], [], []>} : vector<8x8xf32>, vector<8x8xf32>, vector<8x8xf32> -> vector<8x8xf32>
    %cst_105 = arith.constant dense<0xFF800000> : vector<8xf32>
    %271 = vector.multi_reduction <maximumf>, %270, %cst_105 [1] : vector<8x8xf32> to vector<8xf32>
    %272 = vector.shape_cast %271 : vector<8xf32> to vector<8x1xf32>
    %273 = vector.broadcast %272 : vector<8x1xf32> to vector<8x8xf32>
    %274 = arith.subf %270, %273 : vector<8x8xf32>
    %275 = math.exp %274 : vector<8x8xf32>
    %cst_106 = arith.constant dense<0.000000e+00> : vector<8xf32>
    %276 = vector.multi_reduction <add>, %275, %cst_106 [1] : vector<8x8xf32> to vector<8xf32>
    %277 = vector.shape_cast %276 : vector<8xf32> to vector<8x1xf32>
    %278 = tpu.reciprocal %277 {approx = true} : vector<8x1xf32> -> vector<8x1xf32>
    %279 = vector.broadcast %278 : vector<8x1xf32> to vector<8x8xf32>
    %280 = arith.mulf %275, %279 : vector<8x8xf32>
    %cst_107 = arith.constant dense<0.000000e+00> : vector<8x8xf32>
    %281 = tpu.matmul %280, %269, %cst_107 {dimension_numbers = #tpu.dot_dimension_numbers<[1], [0], [0], [1], [0, 0, 1, 1], [], []>} : vector<8x8xf32>, vector<8x8xf32>, vector<8x8xf32> -> vector<8x8xf32>
    %282 = vector.extract_strided_slice %249 {offsets = [0, 16], sizes = [8, 8], strides = [1, 1]} : vector<8x32xf32> to vector<8x8xf32>
    %283 = vector.extract_strided_slice %250 {offsets = [0, 16], sizes = [8, 8], strides = [1, 1]} : vector<8x32xf32> to vector<8x8xf32>
    %284 = vector.extract_strided_slice %251 {offsets = [0, 16], sizes = [8, 8], strides = [1, 1]} : vector<8x32xf32> to vector<8x8xf32>
    %cst_108 = arith.constant dense<0.000000e+00> : vector<8x8xf32>
    %285 = tpu.matmul %282, %283, %cst_108 {dimension_numbers = #tpu.dot_dimension_numbers<[1], [1], [0], [0], [0, 0, 1, 0], [], []>} : vector<8x8xf32>, vector<8x8xf32>, vector<8x8xf32> -> vector<8x8xf32>
    %cst_109 = arith.constant dense<0xFF800000> : vector<8xf32>
    %286 = vector.multi_reduction <maximumf>, %285, %cst_109 [1] : vector<8x8xf32> to vector<8xf32>
    %287 = vector.shape_cast %286 : vector<8xf32> to vector<8x1xf32>
    %288 = vector.broadcast %287 : vector<8x1xf32> to vector<8x8xf32>
    %289 = arith.subf %285, %288 : vector<8x8xf32>
    %290 = math.exp %289 : vector<8x8xf32>
    %cst_110 = arith.constant dense<0.000000e+00> : vector<8xf32>
    %291 = vector.multi_reduction <add>, %290, %cst_110 [1] : vector<8x8xf32> to vector<8xf32>
    %292 = vector.shape_cast %291 : vector<8xf32> to vector<8x1xf32>
    %293 = tpu.reciprocal %292 {approx = true} : vector<8x1xf32> -> vector<8x1xf32>
    %294 = vector.broadcast %293 : vector<8x1xf32> to vector<8x8xf32>
    %295 = arith.mulf %290, %294 : vector<8x8xf32>
    %cst_111 = arith.constant dense<0.000000e+00> : vector<8x8xf32>
    %296 = tpu.matmul %295, %284, %cst_111 {dimension_numbers = #tpu.dot_dimension_numbers<[1], [0], [0], [1], [0, 0, 1, 1], [], []>} : vector<8x8xf32>, vector<8x8xf32>, vector<8x8xf32> -> vector<8x8xf32>
    %297 = vector.extract_strided_slice %249 {offsets = [0, 24], sizes = [8, 8], strides = [1, 1]} : vector<8x32xf32> to vector<8x8xf32>
    %298 = vector.extract_strided_slice %250 {offsets = [0, 24], sizes = [8, 8], strides = [1, 1]} : vector<8x32xf32> to vector<8x8xf32>
    %299 = vector.extract_strided_slice %251 {offsets = [0, 24], sizes = [8, 8], strides = [1, 1]} : vector<8x32xf32> to vector<8x8xf32>
    %cst_112 = arith.constant dense<0.000000e+00> : vector<8x8xf32>
    %300 = tpu.matmul %297, %298, %cst_112 {dimension_numbers = #tpu.dot_dimension_numbers<[1], [1], [0], [0], [0, 0, 1, 0], [], []>} : vector<8x8xf32>, vector<8x8xf32>, vector<8x8xf32> -> vector<8x8xf32>
    %cst_113 = arith.constant dense<0xFF800000> : vector<8xf32>
    %301 = vector.multi_reduction <maximumf>, %300, %cst_113 [1] : vector<8x8xf32> to vector<8xf32>
    %302 = vector.shape_cast %301 : vector<8xf32> to vector<8x1xf32>
    %303 = vector.broadcast %302 : vector<8x1xf32> to vector<8x8xf32>
    %304 = arith.subf %300, %303 : vector<8x8xf32>
    %305 = math.exp %304 : vector<8x8xf32>
    %cst_114 = arith.constant dense<0.000000e+00> : vector<8xf32>
    %306 = vector.multi_reduction <add>, %305, %cst_114 [1] : vector<8x8xf32> to vector<8xf32>
    %307 = vector.shape_cast %306 : vector<8xf32> to vector<8x1xf32>
    %308 = tpu.reciprocal %307 {approx = true} : vector<8x1xf32> -> vector<8x1xf32>
    %309 = vector.broadcast %308 : vector<8x1xf32> to vector<8x8xf32>
    %310 = arith.mulf %305, %309 : vector<8x8xf32>
    %cst_115 = arith.constant dense<0.000000e+00> : vector<8x8xf32>
    %311 = tpu.matmul %310, %299, %cst_115 {dimension_numbers = #tpu.dot_dimension_numbers<[1], [0], [0], [1], [0, 0, 1, 1], [], []>} : vector<8x8xf32>, vector<8x8xf32>, vector<8x8xf32> -> vector<8x8xf32>
    %312 = tpu.concatenate %266, %281, %296, %311 in 1 : vector<8x8xf32>, vector<8x8xf32>, vector<8x8xf32>, vector<8x8xf32> -> vector<8x32xf32>
    %c1_116 = arith.constant 1 : index
    %c0_117 = arith.constant 0 : index
    %c0_118 = arith.constant 0 : index
    %313 = vector.load %arg10[%c1_116, %c0_117, %c0_118] : memref<2x32x32xf32, #tpu.memory_space<vmem>>, vector<1x32x32xf32>
    %314 = vector.shape_cast %313 : vector<1x32x32xf32> to vector<32x32xf32>
    %cst_119 = arith.constant dense<0.000000e+00> : vector<8x32xf32>
    %315 = tpu.matmul %312, %314, %cst_119 {dimension_numbers = #tpu.dot_dimension_numbers<[1], [0], [0], [1], [0, 0, 1, 1], [], []>} : vector<8x32xf32>, vector<32x32xf32>, vector<8x32xf32> -> vector<8x32xf32>
    %c1_120 = arith.constant 1 : index
    %c0_121 = arith.constant 0 : index
    %c0_122 = arith.constant 0 : index
    %316 = vector.load %arg11[%c1_120, %c0_121, %c0_122] : memref<2x1x32xf32, #tpu.memory_space<vmem>>, vector<1x1x32xf32>
    %317 = vector.shape_cast %316 : vector<1x1x32xf32> to vector<1x32xf32>
    %318 = vector.broadcast %317 : vector<1x32xf32> to vector<8x32xf32>
    %319 = arith.addf %315, %318 : vector<8x32xf32>
    %320 = arith.addf %241, %319 : vector<8x32xf32>
    %c1_123 = arith.constant 1 : index
    %c0_124 = arith.constant 0 : index
    %c0_125 = arith.constant 0 : index
    %321 = vector.load %arg12[%c1_123, %c0_124, %c0_125] : memref<2x2x32xf32, #tpu.memory_space<vmem>>, vector<1x2x32xf32>
    %322 = vector.shape_cast %321 : vector<1x2x32xf32> to vector<2x32xf32>
    %323 = vector.extract_strided_slice %322 {offsets = [0, 0], sizes = [1, 32], strides = [1, 1]} : vector<2x32xf32> to vector<1x32xf32>
    %324 = vector.extract_strided_slice %322 {offsets = [1, 0], sizes = [1, 32], strides = [1, 1]} : vector<2x32xf32> to vector<1x32xf32>
    %cst_126 = arith.constant dense<0.000000e+00> : vector<8xf32>
    %325 = vector.multi_reduction <add>, %320, %cst_126 [1] : vector<8x32xf32> to vector<8xf32>
    %326 = vector.shape_cast %325 : vector<8xf32> to vector<8x1xf32>
    %cst_127 = arith.constant 3.200000e+01 : f32
    %327 = vector.broadcast %cst_127 : f32 to vector<8x1xf32>
    %328 = arith.divf %326, %327 : vector<8x1xf32>
    %329 = vector.broadcast %328 : vector<8x1xf32> to vector<8x32xf32>
    %330 = arith.subf %320, %329 : vector<8x32xf32>
    %331 = arith.mulf %330, %330 : vector<8x32xf32>
    %cst_128 = arith.constant dense<0.000000e+00> : vector<8xf32>
    %332 = vector.multi_reduction <add>, %331, %cst_128 [1] : vector<8x32xf32> to vector<8xf32>
    %333 = vector.shape_cast %332 : vector<8xf32> to vector<8x1xf32>
    %cst_129 = arith.constant 3.200000e+01 : f32
    %334 = vector.broadcast %cst_129 : f32 to vector<8x1xf32>
    %335 = arith.divf %333, %334 : vector<8x1xf32>
    %336 = vector.broadcast %328 : vector<8x1xf32> to vector<8x32xf32>
    %337 = arith.subf %320, %336 : vector<8x32xf32>
    %cst_130 = arith.constant 9.99999974E-6 : f32
    %338 = vector.broadcast %cst_130 : f32 to vector<8x1xf32>
    %339 = arith.addf %335, %338 : vector<8x1xf32>
    %340 = math.rsqrt %339 : vector<8x1xf32>
    %341 = vector.broadcast %340 : vector<8x1xf32> to vector<8x32xf32>
    %342 = arith.mulf %337, %341 : vector<8x32xf32>
    %343 = vector.broadcast %323 : vector<1x32xf32> to vector<8x32xf32>
    %344 = arith.mulf %342, %343 : vector<8x32xf32>
    %345 = vector.broadcast %324 : vector<1x32xf32> to vector<8x32xf32>
    %346 = arith.addf %344, %345 : vector<8x32xf32>
    %c1_131 = arith.constant 1 : index
    %c0_132 = arith.constant 0 : index
    %c0_133 = arith.constant 0 : index
    %347 = vector.load %arg13[%c1_131, %c0_132, %c0_133] : memref<2x32x64xf32, #tpu.memory_space<vmem>>, vector<1x32x64xf32>
    %348 = vector.shape_cast %347 : vector<1x32x64xf32> to vector<32x64xf32>
    %cst_134 = arith.constant dense<0.000000e+00> : vector<8x64xf32>
    %349 = tpu.matmul %346, %348, %cst_134 {dimension_numbers = #tpu.dot_dimension_numbers<[1], [0], [0], [1], [0, 0, 1, 1], [], []>} : vector<8x32xf32>, vector<32x64xf32>, vector<8x64xf32> -> vector<8x64xf32>
    %c1_135 = arith.constant 1 : index
    %c0_136 = arith.constant 0 : index
    %c0_137 = arith.constant 0 : index
    %350 = vector.load %arg14[%c1_135, %c0_136, %c0_137] : memref<2x1x64xf32, #tpu.memory_space<vmem>>, vector<1x1x64xf32>
    %351 = vector.shape_cast %350 : vector<1x1x64xf32> to vector<1x64xf32>
    %352 = vector.broadcast %351 : vector<1x64xf32> to vector<8x64xf32>
    %353 = arith.addf %349, %352 : vector<8x64xf32>
    %354 = arith.mulf %353, %353 : vector<8x64xf32>
    %355 = arith.mulf %353, %354 : vector<8x64xf32>
    %cst_138 = arith.constant 4.471500e-02 : f32
    %356 = vector.broadcast %cst_138 : f32 to vector<8x64xf32>
    %357 = arith.mulf %356, %355 : vector<8x64xf32>
    %358 = arith.addf %353, %357 : vector<8x64xf32>
    %cst_139 = arith.constant 0.797884583 : f32
    %359 = vector.broadcast %cst_139 : f32 to vector<8x64xf32>
    %360 = arith.mulf %359, %358 : vector<8x64xf32>
    %361 = math.tanh %360 : vector<8x64xf32>
    %cst_140 = arith.constant 1.000000e+00 : f32
    %362 = vector.broadcast %cst_140 : f32 to vector<8x64xf32>
    %363 = arith.addf %362, %361 : vector<8x64xf32>
    %cst_141 = arith.constant 5.000000e-01 : f32
    %364 = vector.broadcast %cst_141 : f32 to vector<8x64xf32>
    %365 = arith.mulf %364, %363 : vector<8x64xf32>
    %366 = arith.mulf %353, %365 : vector<8x64xf32>
    %c1_142 = arith.constant 1 : index
    %c0_143 = arith.constant 0 : index
    %c0_144 = arith.constant 0 : index
    %367 = vector.load %arg15[%c1_142, %c0_143, %c0_144] : memref<2x64x32xf32, #tpu.memory_space<vmem>>, vector<1x64x32xf32>
    %368 = vector.shape_cast %367 : vector<1x64x32xf32> to vector<64x32xf32>
    %cst_145 = arith.constant dense<0.000000e+00> : vector<8x32xf32>
    %369 = tpu.matmul %366, %368, %cst_145 {dimension_numbers = #tpu.dot_dimension_numbers<[1], [0], [0], [1], [0, 0, 1, 1], [], []>} : vector<8x64xf32>, vector<64x32xf32>, vector<8x32xf32> -> vector<8x32xf32>
    %c1_146 = arith.constant 1 : index
    %c0_147 = arith.constant 0 : index
    %c0_148 = arith.constant 0 : index
    %370 = vector.load %arg16[%c1_146, %c0_147, %c0_148] : memref<2x1x32xf32, #tpu.memory_space<vmem>>, vector<1x1x32xf32>
    %371 = vector.shape_cast %370 : vector<1x1x32xf32> to vector<1x32xf32>
    %372 = vector.broadcast %371 : vector<1x32xf32> to vector<8x32xf32>
    %373 = arith.addf %369, %372 : vector<8x32xf32>
    %374 = arith.addf %346, %373 : vector<8x32xf32>
    %c1_149 = arith.constant 1 : index
    %c0_150 = arith.constant 0 : index
    %c0_151 = arith.constant 0 : index
    %375 = vector.load %arg17[%c1_149, %c0_150, %c0_151] : memref<2x2x32xf32, #tpu.memory_space<vmem>>, vector<1x2x32xf32>
    %376 = vector.shape_cast %375 : vector<1x2x32xf32> to vector<2x32xf32>
    %377 = vector.extract_strided_slice %376 {offsets = [0, 0], sizes = [1, 32], strides = [1, 1]} : vector<2x32xf32> to vector<1x32xf32>
    %378 = vector.extract_strided_slice %376 {offsets = [1, 0], sizes = [1, 32], strides = [1, 1]} : vector<2x32xf32> to vector<1x32xf32>
    %cst_152 = arith.constant dense<0.000000e+00> : vector<8xf32>
    %379 = vector.multi_reduction <add>, %374, %cst_152 [1] : vector<8x32xf32> to vector<8xf32>
    %380 = vector.shape_cast %379 : vector<8xf32> to vector<8x1xf32>
    %cst_153 = arith.constant 3.200000e+01 : f32
    %381 = vector.broadcast %cst_153 : f32 to vector<8x1xf32>
    %382 = arith.divf %380, %381 : vector<8x1xf32>
    %383 = vector.broadcast %382 : vector<8x1xf32> to vector<8x32xf32>
    %384 = arith.subf %374, %383 : vector<8x32xf32>
    %385 = arith.mulf %384, %384 : vector<8x32xf32>
    %cst_154 = arith.constant dense<0.000000e+00> : vector<8xf32>
    %386 = vector.multi_reduction <add>, %385, %cst_154 [1] : vector<8x32xf32> to vector<8xf32>
    %387 = vector.shape_cast %386 : vector<8xf32> to vector<8x1xf32>
    %cst_155 = arith.constant 3.200000e+01 : f32
    %388 = vector.broadcast %cst_155 : f32 to vector<8x1xf32>
    %389 = arith.divf %387, %388 : vector<8x1xf32>
    %390 = vector.broadcast %382 : vector<8x1xf32> to vector<8x32xf32>
    %391 = arith.subf %374, %390 : vector<8x32xf32>
    %cst_156 = arith.constant 9.99999974E-6 : f32
    %392 = vector.broadcast %cst_156 : f32 to vector<8x1xf32>
    %393 = arith.addf %389, %392 : vector<8x1xf32>
    %394 = math.rsqrt %393 : vector<8x1xf32>
    %395 = vector.broadcast %394 : vector<8x1xf32> to vector<8x32xf32>
    %396 = arith.mulf %391, %395 : vector<8x32xf32>
    %397 = vector.broadcast %377 : vector<1x32xf32> to vector<8x32xf32>
    %398 = arith.mulf %396, %397 : vector<8x32xf32>
    %399 = vector.broadcast %378 : vector<1x32xf32> to vector<8x32xf32>
    %400 = arith.addf %398, %399 : vector<8x32xf32>
    %cst_157 = arith.constant dense<0.000000e+00> : vector<32xf32>
    %401 = vector.multi_reduction <add>, %400, %cst_157 [0] : vector<8x32xf32> to vector<32xf32>
    %402 = vector.shape_cast %401 : vector<32xf32> to vector<1x32xf32>
    %cst_158 = arith.constant 8.000000e+00 : f32
    %403 = vector.broadcast %cst_158 : f32 to vector<1x32xf32>
    %404 = arith.divf %402, %403 : vector<1x32xf32>
    %c0_159 = arith.constant 0 : index
    %c0_160 = arith.constant 0 : index
    %405 = vector.load %arg18[%c0_159, %c0_160] : memref<32x128xf32, #tpu.memory_space<vmem>>, vector<32x128xf32>
    %cst_161 = arith.constant dense<0.000000e+00> : vector<1x128xf32>
    %406 = tpu.matmul %404, %405, %cst_161 {dimension_numbers = #tpu.dot_dimension_numbers<[1], [0], [0], [1], [0, 0, 1, 1], [], []>} : vector<1x32xf32>, vector<32x128xf32>, vector<1x128xf32> -> vector<1x128xf32>
    %c0_162 = arith.constant 0 : index
    %c0_163 = arith.constant 0 : index
    %407 = vector.load %arg19[%c0_162, %c0_163] : memref<1x128xf32, #tpu.memory_space<vmem>>, vector<1x128xf32>
    %408 = arith.addf %406, %407 : vector<1x128xf32>
    %c0_164 = arith.constant 0 : index
    %c0_165 = arith.constant 0 : index
    %c0_166 = arith.constant 0 : index
    %409 = vector.load %arg20[%c0_164, %c0_165, %c0_166] : memref<1x1x128xf32, #tpu.memory_space<vmem>>, vector<1x1x128xf32>
    %410 = vector.shape_cast %409 : vector<1x1x128xf32> to vector<1x128xf32>
    %411 = vector.shape_cast %408 : vector<1x128xf32> to vector<1x1x128xf32>
    tpu.vector_store %arg20[%c0_164, %c0_165, %c0_166], %411 {strides = array<i32>} : memref<1x1x128xf32, #tpu.memory_space<vmem>>, vector<1x1x128xf32>,
    return
  }
  func.func @transform_0(%arg0: i32) -> (i32, i32, i32) {
    %c0_i32 = arith.constant 0 : i32
    %c0_i32_0 = arith.constant 0 : i32
    %c0_i32_1 = arith.constant 0 : i32
    return %arg0, %c0_i32, %c0_i32_0 : i32, i32, i32
  }
  func.func @transform_1(%arg0: i32) -> (i32, i32) {
    %c0_i32 = arith.constant 0 : i32
    %c0_i32_0 = arith.constant 0 : i32
    %c0_i32_1 = arith.constant 0 : i32
    return %c0_i32, %c0_i32_0 : i32, i32
  }
  func.func @transform_2(%arg0: i32) -> (i32, i32) {
    %c0_i32 = arith.constant 0 : i32
    %c0_i32_0 = arith.constant 0 : i32
    %c0_i32_1 = arith.constant 0 : i32
    return %c0_i32, %c0_i32_0 : i32, i32
  }
  func.func @transform_3(%arg0: i32) -> (i32, i32) {
    %c0_i32 = arith.constant 0 : i32
    %c0_i32_0 = arith.constant 0 : i32
    %c0_i32_1 = arith.constant 0 : i32
    return %c0_i32, %c0_i32_0 : i32, i32
  }
  func.func @transform_4(%arg0: i32) -> (i32, i32) {
    %c0_i32 = arith.constant 0 : i32
    %c0_i32_0 = arith.constant 0 : i32
    %c0_i32_1 = arith.constant 0 : i32
    return %c0_i32, %c0_i32_0 : i32, i32
  }
  func.func @transform_5(%arg0: i32) -> (i32, i32) {
    %c0_i32 = arith.constant 0 : i32
    %c0_i32_0 = arith.constant 0 : i32
    %c0_i32_1 = arith.constant 0 : i32
    return %c0_i32, %c0_i32_0 : i32, i32
  }
  func.func @transform_6(%arg0: i32) -> (i32, i32) {
    %c0_i32 = arith.constant 0 : i32
    %c0_i32_0 = arith.constant 0 : i32
    %c0_i32_1 = arith.constant 0 : i32
    return %c0_i32, %c0_i32_0 : i32, i32
  }
  func.func @transform_7(%arg0: i32) -> (i32, i32, i32) {
    %c0_i32 = arith.constant 0 : i32
    %c0_i32_0 = arith.constant 0 : i32
    %c0_i32_1 = arith.constant 0 : i32
    %c0_i32_2 = arith.constant 0 : i32
    return %c0_i32, %c0_i32_0, %c0_i32_1 : i32, i32, i32
  }
  func.func @transform_8(%arg0: i32) -> (i32, i32, i32) {
    %c0_i32 = arith.constant 0 : i32
    %c0_i32_0 = arith.constant 0 : i32
    %c0_i32_1 = arith.constant 0 : i32
    %c0_i32_2 = arith.constant 0 : i32
    return %c0_i32, %c0_i32_0, %c0_i32_1 : i32, i32, i32
  }
  func.func @transform_9(%arg0: i32) -> (i32, i32, i32) {
    %c0_i32 = arith.constant 0 : i32
    %c0_i32_0 = arith.constant 0 : i32
    %c0_i32_1 = arith.constant 0 : i32
    %c0_i32_2 = arith.constant 0 : i32
    return %c0_i32, %c0_i32_0, %c0_i32_1 : i32, i32, i32
  }
  func.func @transform_10(%arg0: i32) -> (i32, i32, i32) {
    %c0_i32 = arith.constant 0 : i32
    %c0_i32_0 = arith.constant 0 : i32
    %c0_i32_1 = arith.constant 0 : i32
    %c0_i32_2 = arith.constant 0 : i32
    return %c0_i32, %c0_i32_0, %c0_i32_1 : i32, i32, i32
  }
  func.func @transform_11(%arg0: i32) -> (i32, i32, i32) {
    %c0_i32 = arith.constant 0 : i32
    %c0_i32_0 = arith.constant 0 : i32
    %c0_i32_1 = arith.constant 0 : i32
    %c0_i32_2 = arith.constant 0 : i32
    return %c0_i32, %c0_i32_0, %c0_i32_1 : i32, i32, i32
  }
  func.func @transform_12(%arg0: i32) -> (i32, i32, i32) {
    %c0_i32 = arith.constant 0 : i32
    %c0_i32_0 = arith.constant 0 : i32
    %c0_i32_1 = arith.constant 0 : i32
    %c0_i32_2 = arith.constant 0 : i32
    return %c0_i32, %c0_i32_0, %c0_i32_1 : i32, i32, i32
  }
  func.func @transform_13(%arg0: i32) -> (i32, i32, i32) {
    %c0_i32 = arith.constant 0 : i32
    %c0_i32_0 = arith.constant 0 : i32
    %c0_i32_1 = arith.constant 0 : i32
    %c0_i32_2 = arith.constant 0 : i32
    return %c0_i32, %c0_i32_0, %c0_i32_1 : i32, i32, i32
  }
  func.func @transform_14(%arg0: i32) -> (i32, i32, i32) {
    %c0_i32 = arith.constant 0 : i32
    %c0_i32_0 = arith.constant 0 : i32
    %c0_i32_1 = arith.constant 0 : i32
    %c0_i32_2 = arith.constant 0 : i32
    return %c0_i32, %c0_i32_0, %c0_i32_1 : i32, i32, i32
  }
  func.func @transform_15(%arg0: i32) -> (i32, i32, i32) {
    %c0_i32 = arith.constant 0 : i32
    %c0_i32_0 = arith.constant 0 : i32
    %c0_i32_1 = arith.constant 0 : i32
    %c0_i32_2 = arith.constant 0 : i32
    return %c0_i32, %c0_i32_0, %c0_i32_1 : i32, i32, i32
  }
  func.func @transform_16(%arg0: i32) -> (i32, i32, i32) {
    %c0_i32 = arith.constant 0 : i32
    %c0_i32_0 = arith.constant 0 : i32
    %c0_i32_1 = arith.constant 0 : i32
    %c0_i32_2 = arith.constant 0 : i32
    return %c0_i32, %c0_i32_0, %c0_i32_1 : i32, i32, i32
  }
  func.func @transform_17(%arg0: i32) -> (i32, i32) {
    %c0_i32 = arith.constant 0 : i32
    %c0_i32_0 = arith.constant 0 : i32
    %c0_i32_1 = arith.constant 0 : i32
    return %c0_i32, %c0_i32_0 : i32, i32
  }
  func.func @transform_18(%arg0: i32) -> (i32, i32) {
    %c0_i32 = arith.constant 0 : i32
    %c0_i32_0 = arith.constant 0 : i32
    %c0_i32_1 = arith.constant 0 : i32
    return %c0_i32, %c0_i32_0 : i32, i32
  }
  func.func @transform_19(%arg0: i32) -> (i32, i32, i32) {
    %c0_i32 = arith.constant 0 : i32
    %c0_i32_0 = arith.constant 0 : i32
    %c0_i32_1 = arith.constant 0 : i32
    return %arg0, %c0_i32, %c0_i32_0 : i32, i32, i32
  }
}

</mosaic_0001>

<bundles_post_ra>
// kernel: forward.1
= control target key start
LH: loop header
LB: loop body
LE: loop exit
PB: predicated region body
PF: predicated region fallthrough
CT: control target
= control target key end

     0   :  { %s4755_s0 = inlined_call_operand.vmem [shape: f32[2,8,256], index: 0, kind: input, shape index: {}]   ;;  %s4756_s1 = inlined_call_operand.vmem [shape: f32[256,32], index: 1, kind: input, shape index: {}]   ;;  %s4757_s2 = inlined_call_operand.vmem [shape: f32[1,32], index: 2, kind: input, shape index: {}]   ;;  %s4758_s3 = inlined_call_operand.vmem [shape: f32[2,32], index: 3, kind: input, shape index: {}]   ;;  %s4759_s4 = inlined_call_operand.vmem [shape: f32[128,32], index: 4, kind: input, shape index: {}]   ;;  %s4760_s5 = inlined_call_operand.vmem [shape: f32[1,32], index: 5, kind: input, shape index: {}]   ;;  %s4761_s6 = inlined_call_operand.vmem [shape: f32[2,32], index: 6, kind: input, shape index: {}]   ;;  %s4762_s7 = inlined_call_operand.vmem [shape: f32[2,32,96], index: 7, kind: input, shape index: {}]   ;;  %s4763_s8 = inlined_call_operand.vmem [shape: f32[2,1,96], index: 8, kind: input, shape index: {}]   ;;  %s4764_s9 = inlined_call_operand.vmem [shape: f32[2,32,32], index: 9, kind: input, shape index: {}]   ;;  %s4765_s10 = inlined_call_operand.vmem [shape: f32[2,1,32], index: 10, kind: input, shape index: {}]   ;;  %s4766_s11 = inlined_call_operand.vmem [shape: f32[2,2,32], index: 11, kind: input, shape index: {}]   ;;  %s4767_s12 = inlined_call_operand.vmem [shape: f32[2,32,64], index: 12, kind: input, shape index: {}]   ;;  %s4768_s13 = inlined_call_operand.vmem [shape: f32[2,1,64], index: 13, kind: input, shape index: {}]   ;;  %s4769_s14 = inlined_call_operand.vmem [shape: f32[2,64,32], index: 14, kind: input, shape index: {}]   ;;  %s4770_s15 = inlined_call_operand.vmem [shape: f32[2,1,32], index: 15, kind: input, shape index: {}]   ;;  %s4771_s16 = inlined_call_operand.vmem [shape: f32[2,2,32], index: 16, kind: input, shape index: {}]   ;;  %s4772_s17 = inlined_call_operand.vmem [shape: f32[32,128], index: 17, kind: input, shape index: {}]   ;;  %s4773_s18 = inlined_call_operand.vmem [shape: f32[1,128], index: 18, kind: input, shape index: {}]   ;;  %s4774_s19 = inlined_call_operand.hbm [shape: f32[2,1,128], index: 19, kind: output, shape index: {}]  }
   0x1   :  { %4792 = sst [smem:[#allocation11_spill]] %s4755_s0 }
   0x2   :  { %4793 = sst [smem:[#allocation12_spill]] %s4756_s1 }
   0x3   :  { %4794 = sst [smem:[#allocation13_spill]] %s4757_s2 }
   0x4   :  { %4795 = sst [smem:[#allocation14_spill]] %s4758_s3 }
   0x5   :  { %4796 = sst [smem:[#allocation15_spill]] %s4773_s18 }
   0x6   :  { %4797 = sst [smem:[#allocation16_spill]] %s4774_s19 }
   0x7   :  { %24 = vsyncpa [#allocation3], 0 }
   0x8   :  { %26 = vsyncpa [#allocation3 + $0x1], 0  ;;  %s4071_s0 = smov 0   ;;  %s4073_s30 = smov 0  }
   0x9   :  { %s4075_s20 = smov 0   ;;  %s4077_s21 = smov 0  }
   0xa LB: > { %4798 = sst [smem:[#allocation5_spill]] %s3938_s0  ;;  %s4092_s1 = sadd.s32 4294967295, %s3950_s21   ;;  %s3950_s21 = sphi %s4077_s21, %s4824_s21   ;;  %s3946_s20 = sphi %s4075_s20, %s4826_s20   ;;  %s3942_s30 = sphi %s4073_s30, %s4828_s30   ;;  %s3938_s0 = sphi %s4071_s0, %s4827_s0  }
   0xb   : > { %4799 = sst [smem:[#allocation6_spill]] %s3946_s20  ;;  %s3213_s22 = sadd.s32 4294967294, %s3950_s21  }
   0xc   : > { %4800 = sst [smem:[#allocation7_spill]] %s3950_s21  ;;  %s4096_s2 = sadd.s32 1, %s3950_s21  }
   0xd   : > { %4801 = sst [smem:[#allocation8_spill]] %s4096_s2  ;;  %s443_s23 = sadd.s32 1, %s3946_s20 }
   0xe   : > { %s440_s24 = ssub.s32 %s3950_s21, %s4096_s2  ;;  %p453_p0 = scmp.ne.s32.totalorder %s3946_s20, %s3942_s30 }
   0xf   : > { %p441_p1 = scmp.eq.s32.totalorder %s440_s24, 0  ;;  %p454_p2 = scmp.eq.s32.totalorder %s4092_s1, 1 }
  0x10   : > { %p459_p3 = scmp.ne.s32.totalorder %s3942_s30, %s3938_s0  ;;  %p460_p4 = scmp.eq.s32.totalorder %s3213_s22, 1 }
  0x11   : > { %s4107_s25 = scalar_select %p441_p1, %s3946_s20, %s443_s23  }
  0x12   : > { %p4109_p5 = por %p454_p2, %p453_p0  ;;  %p4113_p6 = por %p460_p4, %p459_p3 }
  0x13   : > { %4802 = sst [smem:[#allocation9_spill]] %s4107_s25  ;;  %p3216_p7 = scmp.ge.s32.totalorder %s3950_s21, 1 }
  0x14   : > { %s4804_s26 = scalar_select %p4113_p6, 1, 0 }
  0x15   : > { %p540_p8 = scmp.lt.s32.totalorder %s3950_s21, 3 }
  0x16   : > { %4805 = sst [smem:[#allocation10_spill]] %s4804_s26 }
  0x17   : > { %p541_p9 = pnand %p3216_p7, %p540_p8 }
  0x18   : > { %s4806_s29 = sld [smem:[#allocation12_spill]] (!%p541_p9)  ;;  %p595_p10 = scmp.lt.s32.totalorder (!%p541_p9), %s4092_s1, 1  ;;  %vm712_vm0 = vcmask (!%p541_p9), 261120   ;;  %v771_v61 = vld [vmem:[%s4759_s4] sm:$0xff] (!%p541_p9)  ;;  %v772_v62 = vld [vmem:[%s4759_s4 + $0x8] sm:$0xff] (!%p541_p9)  ;;  %v773_v63 = vld [vmem:[%s4759_s4 + $0x10] sm:$0xff] (!%p541_p9) }
  0x19   : > { %544 = sbr.rel (%p541_p9) target bundleno = 7095 (0x1bb7), region = 96  ;;  %s4807_s19 = sld [smem:[#allocation11_spill]] (!%p541_p9)  ;;  %vm3953_vm1 = vmmov (!%p541_p9), 0   ;;  %vm740_vm2 = vcmask (!%p541_p9), 1041408   ;;  %vm759_vm3 = vcmask (!%p541_p9), 1044480   ;;  %vm745_vm4 = vcmask (!%p541_p9), 1046528  }
  0x1a   : > { %s4808_s23 = sld [smem:[#allocation13_spill]] (!%p541_p9)  ;;  %s4809_s2 = sld [smem:[#allocation14_spill]] (!%p541_p9)  ;;  %vm752_vm5 = vcmask (!%p541_p9), 1045504   ;;  %vm767_vm6 = vcmask (!%p541_p9), 523264   ;;  %vm769_vm7 = vcmask (!%p541_p9), 785408   ;;  %vm985_vm8 = vcmask (!%p541_p9), 64512  }
  0x1b   : > { %s3956_s28 = smov (!%p541_p9), 32   ;;  %s4784_s22 = smov (!%p541_p9), 64   ;;  %vm1655_vm9 = vcmask (!%p541_p9), 130048   ;;  %vm1657_vm10 = vcmask (!%p541_p9), 195584  }
  0x1c   : > { %s3958_s24 = smov (!%p541_p9), 88   ;;  %s3959_s20 = smov (!%p541_p9), 120  }
  0x1d   : > { %s4788_s21 = smov (!%p541_p9), 112   ;;  %s4786_s26 = smov (!%p541_p9), 56  }
  0x1e   : > { %v618_v0 = vld [vmem:[%s4806_s29 + $0x80] sm:$0xff] (!%p541_p9)  ;;  %v619_v1 = vld [vmem:[%s4806_s29 + $0x88] sm:$0xff] (!%p541_p9)  ;;  %v620_v5 = vld [vmem:[%s4806_s29 + $0x90] sm:$0xff] (!%p541_p9) }
  0x1f   : > { %v602_v2 = vld [vmem:[%s4806_s29] sm:$0xff] (!%p541_p9)  ;;  %v3659_v3 = vpack.c.bf16 (!%p541_p9), %v619_v1, %v618_v0  ;;  %v603_v4 = vld [vmem:[%s4806_s29 + $0x8] sm:$0xff] (!%p541_p9)  ;;  %v621_v6 = vld [vmem:[%s4806_s29 + $0x98] sm:$0xff] (!%p541_p9)  ;;  %v3952_v0 = vmov (!%p541_p9), 0.0|0.0   ;;  %v3692_v1 = vpack.c.bf16 (!%p541_p9), %v772_v62, %v771_v61 }
  0x20   : > { %v3661_v7 = vpack.c.bf16 %v603_v4, %v602_v2  ;;  %v3663_v8 = vpack.c.bf16 %v621_v6, %v620_v5  ;;  %v604_v9 = vld [vmem:[%s4806_s29 + $0x10] sm:$0xff]  ;;  %v605_v10 = vld [vmem:[%s4806_s29 + $0x18] sm:$0xff]  ;;  %v622_v11 = vld [vmem:[%s4806_s29 + $0xa0] sm:$0xff]  ;;  %s596_s0 = scalar_select %p595_p10, %s4092_s1, 1  ;;  %3691 = vmatprep.subr.bf16.mxu1 %v3952_v0 }
  0x21   : > { %3660 = vmatprep.subr.bf16.mxu0 %v3659_v3  ;;  %v623_v12 = vld [vmem:[%s4806_s29 + $0xa8] sm:$0xff]  ;;  %v3665_v13 = vpack.c.bf16 %v605_v10, %v604_v9  ;;  %v606_v15 = vld [vmem:[%s4806_s29 + $0x20] sm:$0xff]  ;;  %v624_v17 = vld [vmem:[%s4806_s29 + $0xb0] sm:$0xff]  ;;  %3693 = vmatpush3.bf16.msra.mxu1 %v3692_v1 }
  0x22   : > { %3662 = vmatpush3.bf16.msra.mxu0 %v3661_v7  ;;  %s3291_s27 = sshll.u32 %s596_s0, 4  ;;  %v3667_v14 = vpack.c.bf16 %v623_v12, %v622_v11  ;;  %v607_v16 = vld [vmem:[%s4806_s29 + $0x28] sm:$0xff]  ;;  %v625_v18 = vld [vmem:[%s4806_s29 + $0xb8] sm:$0xff]  ;;  %v608_v21 = vld [vmem:[%s4806_s29 + $0x30] sm:$0xff]  ;;  %3694 = vmatprep.subr.bf16.mxu1 %v3952_v0  ;;  %s3955_s0 = smov 96  }
  0x23   : > { %3664 = vmatprep.subr.bf16.mxu0 %v3663_v8  ;;  %s4166_s18 = scalar_lea.vmem %s4807_s19, %s3291_s27  ;;  %v3669_v19 = vpack.c.bf16 %v607_v16, %v606_v15  ;;  %v3671_v20 = vpack.c.bf16 %v625_v18, %v624_v17  ;;  %v609_v22 = vld [vmem:[%s4806_s29 + $0x38] sm:$0xff]  ;;  %v626_v23 = vld [vmem:[%s4806_s29 + $0xc0] sm:$0xff]  ;;  %v627_v24 = vld [vmem:[%s4806_s29 + $0xc8] sm:$0xff]  ;;  %s3961_s19 = smov 72  }
  0x24   : > { %v601_v25 = vld [vmem:[%s4166_s18 + $0x8] sm:$0xff]  ;;  %v3673_v26 = vpack.c.bf16 %v609_v22, %v608_v21  ;;  %v3675_v27 = vpack.c.bf16 %v627_v24, %v626_v23  ;;  %v610_v28 = vld [vmem:[%s4806_s29 + $0x40] sm:$0xff]  ;;  %v628_v30 = vld [vmem:[%s4806_s29 + $0xd0] sm:$0xff]  ;;  %v727_v21 = vlaneseq  ;;  %s4787_s27 = smov 104  }
  0x25   : > { %705 = vmatprep.mubr.f32.mxu0 %v601_v25  ;;  %v611_v29 = vld [vmem:[%s4806_s29 + $0x48] sm:$0xff]  ;;  %v629_v31 = vld [vmem:[%s4806_s29 + $0xd8] sm:$0xff]  ;;  %v612_v34 = vld [vmem:[%s4806_s29 + $0x50] sm:$0xff] }
  0x26   : > { %3666 = vmatpush3.bf16.msra.mxu0 %v3665_v13  ;;  %v3677_v32 = vpack.c.bf16 %v611_v29, %v610_v28  ;;  %v3679_v33 = vpack.c.bf16 %v629_v31, %v628_v30  ;;  %v613_v35 = vld [vmem:[%s4806_s29 + $0x58] sm:$0xff]  ;;  %v630_v36 = vld [vmem:[%s4806_s29 + $0xe0] sm:$0xff]  ;;  %v631_v37 = vld [vmem:[%s4806_s29 + $0xe8] sm:$0xff]  ;;  %v728_v23 = vshrl.u32 %v727_v21, 7 }
  0x27   : > { %3668 = vmatprep.subr.bf16.mxu0 %v3667_v14  ;;  %v3681_v38 = vpack.c.bf16 %v613_v35, %v612_v34  ;;  %v3683_v39 = vpack.c.bf16 %v631_v37, %v630_v36  ;;  %v614_v40 = vld [vmem:[%s4806_s29 + $0x60] sm:$0xff]  ;;  %v615_v41 = vld [vmem:[%s4806_s29 + $0x68] sm:$0xff]  ;;  %v632_v42 = vld [vmem:[%s4806_s29 + $0xf0] sm:$0xff]  ;;  %v3954_v36 = vmov 0.0  }
  0x28   : > { %v633_v43 = vld [vmem:[%s4806_s29 + $0xf8] sm:$0xff]  ;;  %v3685_v44 = vpack.c.bf16 %v615_v41, %v614_v40  ;;  %v616_v46 = vld [vmem:[%s4806_s29 + $0x70] sm:$0xff]  ;;  %v600_v49 = vld [vmem:[%s4166_s18] sm:$0xff]  ;;  %v4280_v24 = vsub.s32 0, %v728_v23  ;;  %3461 = vmatprep.mubr.msk.f32.mxu1 %vm3953_vm1, %v3954_v36  ;;  %s4791_s18 = smov 8  }
  0x29   : > { %v3687_v45 = vpack.c.bf16 %v633_v43, %v632_v42  ;;  %v617_v47 = vld [vmem:[%s4806_s29 + $0x78] sm:$0xff]  ;;  %v3219_v52 = vld [vmem:[%s4808_s23] ss:$0 sm:$0xff]  ;;  %v776_v5 = vld [vmem:[%s4759_s4 + $0x28] sm:$0xff]  ;;  %s4785_s23 = smov 48  }
  0x2a   : > { %3670 = vmatpush3.bf16.msra.mxu0 %v3669_v19  ;;  %v3689_v48 = vpack.c.bf16 %v617_v47, %v616_v46  ;;  %v774_v2 = vld [vmem:[%s4759_s4 + $0x18] sm:$0xff]  ;;  %v775_v4 = vld [vmem:[%s4759_s4 + $0x20] sm:$0xff]  ;;  %v777_v7 = vld [vmem:[%s4759_s4 + $0x30] sm:$0xff] }
  0x2b   : > { %3672 = vmatprep.subr.bf16.mxu0 %v3671_v20  ;;  %v3695_v3 = vpack.c.bf16 %v774_v2, %v773_v63  ;;  %v3698_v6 = vpack.c.bf16 %v776_v5, %v775_v4  ;;  %v778_v8 = vld [vmem:[%s4759_s4 + $0x38] sm:$0xff]  ;;  %v779_v10 = vld [vmem:[%s4759_s4 + $0x40] sm:$0xff]  ;;  %v780_v11 = vld [vmem:[%s4759_s4 + $0x48] sm:$0xff] }
  0x2c   : > { %v3701_v9 = vpack.c.bf16 %v778_v8, %v777_v7  ;;  %v3704_v12 = vpack.c.bf16 %v780_v11, %v779_v10  ;;  %v781_v13 = vld [vmem:[%s4759_s4 + $0x50] sm:$0xff]  ;;  %v782_v14 = vld [vmem:[%s4759_s4 + $0x58] sm:$0xff]  ;;  %v783_v16 = vld [vmem:[%s4759_s4 + $0x60] sm:$0xff] }
  0x2d   : > { %3696 = vmatpush3.bf16.msra.mxu1 %v3695_v3  ;;  %v3707_v15 = vpack.c.bf16 %v782_v14, %v781_v13  ;;  %v784_v17 = vld [vmem:[%s4759_s4 + $0x68] sm:$0xff]  ;;  %v711_v25 = vld [vmem:[%s4809_s2] sm:$0x3]  ;;  %v785_v29 = vld [vmem:[%s4759_s4 + $0x70] sm:$0xff]  ;;  %s3960_s2 = smov 80  }
  0x2e   : > { %3674 = vmatpush3.bf16.msra.mxu0 %v3673_v26  ;;  %3697 = vmatprep.subr.bf16.mxu1 %v3952_v0  ;;  %v3710_v18 = vpack.c.bf16 %v784_v17, %v783_v16  ;;  %v4285_v26 = vsub.s32 1, %v728_v23  ;;  %v786_v30 = vld [vmem:[%s4759_s4 + $0x78] sm:$0xff]  ;;  %v899_v13 = vld [vmem:[%s4762_s7 + $0x8] sm:$0xff]  ;;  %v874_v21 = vld [vmem:[%s4761_s6] sm:$0x3] }
  0x2f   : > { %3676 = vmatprep.subr.bf16.mxu0 %v3675_v27  ;;  %v730_v27 = vrot.slane %v711_v25, %v4280_v24  ;;  %v901_v16 = vld [vmem:[%s4762_s7 + $0x18] sm:$0xff] }
  0x31   : > { %3699 = vmatpush3.bf16.msra.mxu1 %v3698_v6 }
  0x32   : > { %3678 = vmatpush3.bf16.msra.mxu0 %v3677_v32  ;;  %3700 = vmatprep.subr.bf16.mxu1 %v3952_v0  ;;  %v735_v32 = vrot.slane %v711_v25, %v4285_v26 }
  0x33   : > { %3680 = vmatprep.subr.bf16.mxu0 %v3679_v33  ;;  %v3713_v33 = vpack.c.bf16 %v786_v30, %v785_v29  ;;  %v3221_v30 = vld [vmem:[%s4763_s8] ss:$0 sm:$0xff] }
  0x35   : > { %3702 = vmatpush3.bf16.msra.mxu1 %v3701_v9 }
  0x36   : > { %3682 = vmatpush3.bf16.msra.mxu0 %v3681_v38  ;;  %3703 = vmatprep.subr.bf16.mxu1 %v3952_v0 }
  0x37   : > { %3684 = vmatprep.subr.bf16.mxu0 %v3683_v39 }
  0x39   : > { %3705 = vmatpush3.bf16.msra.mxu1 %v3704_v12  ;;  %v898_v12 = vld [vmem:[%s4762_s7] sm:$0xff] }
  0x3a   : > { %3686 = vmatpush3.bf16.msra.mxu0 %v3685_v44  ;;  %3706 = vmatprep.subr.bf16.mxu1 %v3952_v0  ;;  %v3716_v14 = vpack.c.bf16 %v899_v13, %v898_v12 }
  0x3b   : > { %3688 = vmatprep.subr.bf16.mxu0 %v3687_v45 }
  0x3d   : > { %3708 = vmatpush3.bf16.msra.mxu1 %v3707_v15  ;;  %v900_v15 = vld [vmem:[%s4762_s7 + $0x10] sm:$0xff] }
  0x3e   : > { %3690 = vmatpush3.bf16.msra.mxu0 %v3689_v48  ;;  %3709 = vmatprep.subr.bf16.mxu1 %v3952_v0  ;;  %v3719_v17 = vpack.c.bf16 %v901_v16, %v900_v15 }
  0x3f   : > { %3715 = vmatprep.subr.bf16.mxu0 %v3952_v0 }
  0x41   : > { %706 = vmatmul.mubr.f32.vlgmr.msra.gmra.mrb[0].mxu0 %v600_v49  ;;  %3711 = vmatpush3.bf16.msra.mxu1 %v3710_v18 }
  0x42   : > { %3712 = vmatprep.subr.bf16.mxu1 %v3952_v0  ;;  %3472 = vmatprep.mubr.msk.f32.mxu0 %vm3953_vm1, %v3954_v36 }
  0x43   : > { %3717 = vmatpush3.bf16.msra.mxu0 %v3716_v14 }
  0x44   : > { %3718 = vmatprep.subr.bf16.mxu0 %v3952_v0 }
  0x45   : > { %3714 = vmatpush3.bf16.msra.mxu1 %v3713_v33 }
  0x46   : > { %3475 = vmatprep.subr.mxu1 %v3954_v36 }
  0x47   : > { %3720 = vmatpush3.bf16.msra.mxu0 %v3719_v17 }
  0x48   : > { %3495 = vmatprep.subr.mxu0 %v3954_v36 }
 0x114   : > { %v3324_v50 = vpop.f32.mrb[0].mxu0 }
 0x115   : > { %v3325_v51 = vpop.f32.mrb[1].mxu0 }
 0x116   : > { %v3326_v53 = vadd.f32 %v3325_v51, %v3324_v50 }
 0x118   : > { %v708_v54 = vadd.f32 %v3326_v53, %v3219_v52 }
 0x11a   : > { %v713_v55 = vsel %vm712_vm0, %v708_v54, 0.0 }
 0x11b   : > { %714 = vadd.xlane.f32.xlu0 %v713_v55  ;;  %v3220_v55 = vld [vmem:[%s4760_s5] ss:$0 sm:$0xff] }
 0x1a8   : > { %v715_v56 = vpop.xlane.xlu0 %714 }
 0x1a9   : > { %v717_v57 = vmul.f32 0.03125, %v715_v56 }
 0x1ab   : > { %v718_v58 = vsub.f32 %v708_v54, %v717_v57 }
 0x1ad   : > { %v719_v59 = vmul.f32 %v718_v58, %v718_v58 }
 0x1af   : > { %v720_v60 = vsel %vm712_vm0, %v719_v59, 0.0 }
 0x1b0   : > { %721 = vadd.xlane.f32.xlu0 %v720_v60 }
 0x23d   : > { %v722_v19 = vpop.xlane.xlu0 %721 }
 0x23e   : > { %v723_v20 = vmul.f32 0.03125, %v722_v19 }
 0x240   : > { %v724_v22 = vadd.f32 1e-05, %v723_v20 }
 0x242   : > { %3838 = vrsqrt.f32 %v724_v22  ;;  %v891_v22 = vrot.slane %v874_v21, %v4280_v24 }
 0x24c   : > { %v3839_v28 = vpop.eup %3838 }
 0x24d   : > { %v726_v31 = vmul.f32 %v3839_v28, %v718_v58 }
 0x24f   : > { %v731_v34 = vmul.f32 %v730_v27, %v726_v31  ;;  %v896_v27 = vrot.slane %v874_v21, %v4285_v26 }
 0x251   : > { %v736_v35 = vadd.f32 %v735_v32, %v731_v34 }
 0x253   : > { %v738_v37 = vrot.slane %v736_v35, 6 }
 0x255   : > { %v741_v38 = vsel %vm740_vm2, 0.0, %v738_v37  ;;  %v742_v39 = vsel %vm740_vm2, %v738_v37, 0.0 }
 0x256   : > { %v760_v40 = vrot.slane %v741_v38, 3  ;;  %v761_v41 = vrot.slane %v742_v39, 3  ;;  %v746_v42 = vrot.slane %v741_v38, 1  ;;  %v747_v43 = vrot.slane %v742_v39, 1 }
 0x257   : > { %v753_v46 = vrot.slane %v741_v38, 2  ;;  %v754_v47 = vrot.slane %v742_v39, 2 }
 0x258   : > { %v762_v44 = vsel %vm759_vm3, %v760_v40, %v761_v41  ;;  %v748_v45 = vsel %vm745_vm4, %v746_v42, %v747_v43 }
 0x259   : > { %763 = vrot.lane.b32.xlu0 %v762_v44, %s3955_s0  ;;  %749 = vrot.lane.b32.xlu1 %v748_v45, %s3956_s28  ;;  %v755_v48 = vsel %vm752_vm5, %v753_v46, %v754_v47  ;;  %s4783_s28 = smov 40  }
 0x25d   : > { %756 = vrot.lane.b32.xlu1 %v755_v48, %s4784_s22 }
 0x2cb   : > { %v750_v49 = vpop.permute.xlu1 %749  ;;  %v764_v52 = vpop.permute.xlu0 %763 }
 0x2cc   : > { %v766_v50 = vsel %vm712_vm0, %v741_v38, %v750_v49 }
 0x2cf   : > { %v757_v51 = vpop.permute.xlu1 %756 }
 0x2d0   : > { %v768_v53 = vsel %vm767_vm6, %v766_v50, %v757_v51 }
 0x2d1   : > { %v770_v54 = vsel %vm769_vm7, %v768_v53, %v764_v52 }
 0x2d2   : > { %3462 = vmatmul.mubr.f32.vlgmr.msra.gmra.mrb[0].mxu1 %v770_v54 }
 0x2d3   : > { %3477 = vmatprep.mubr.msk.f32.mxu1 %vm3953_vm1, %v3954_v36 }
 0x3a5   : > { %v860_v56 = vpop.f32.mrb[0].mxu1 }
 0x3a6   : > { %v861_v57 = vadd.f32 %v3220_v55, %v860_v56  ;;  %v3463_v58 = vpop.f32.mrb[1].mxu1 }
 0x3a8   : > { %v864_v59 = vmul.f32 %v861_v57, %v861_v57 }
 0x3aa   : > { %v865_v60 = vmul.f32 %v864_v59, %v861_v57 }
 0x3ac   : > { %v866_v61 = vmul.f32 0.044715, %v865_v60 }
 0x3ae   : > { %v867_v62 = vadd.f32 %v866_v61, %v861_v57 }
 0x3b0   : > { %v868_v63 = vmul.f32 0.7978846, %v867_v62 }
 0x3b2   : > { %3840 = vtanh.f32 %v868_v63 }
 0x3bc   : > { %v3841_v1 = vpop.eup %3840 }
 0x3bd   : > { %v870_v2 = vadd.f32 1.0, %v3841_v1 }
 0x3bf   : > { %v871_v3 = vmul.f32 0.5, %v870_v2 }
 0x3c1   : > { %v872_v4 = vmul.f32 %v871_v3, %v861_v57 }
 0x3c3   : > { %v873_v5 = vadd.f32 %v872_v4, %v736_v35 }
 0x3c5   : > { %v875_v6 = vsel %vm712_vm0, %v873_v5, 0.0 }
 0x3c6   : > { %876 = vadd.xlane.f32.xlu1 %v875_v6 }
 0x453   : > { %v877_v7 = vpop.xlane.xlu1 %876 }
 0x454   : > { %v878_v8 = vmul.f32 0.03125, %v877_v7 }
 0x456   : > { %v879_v9 = vsub.f32 %v873_v5, %v878_v8 }
 0x458   : > { %v880_v10 = vmul.f32 %v879_v9, %v879_v9 }
 0x45a   : > { %v881_v11 = vsel %vm712_vm0, %v880_v10, 0.0 }
 0x45b   : > { %882 = vadd.xlane.f32.xlu0 %v881_v11 }
 0x4e8   : > { %v883_v18 = vpop.xlane.xlu0 %882 }
 0x4e9   : > { %v884_v19 = vmul.f32 0.03125, %v883_v18 }
 0x4eb   : > { %v885_v20 = vadd.f32 1e-05, %v884_v19 }
 0x4ed   : > { %3842 = vrsqrt.f32 %v885_v20 }
 0x4f7   : > { %v3843_v23 = vpop.eup %3842 }
 0x4f8   : > { %v887_v25 = vmul.f32 %v3843_v23, %v879_v9 }
 0x4fa   : > { %v892_v28 = vmul.f32 %v891_v22, %v887_v25 }
 0x4fc   : > { %v4330_v29 = vadd.f32 %v896_v27, %v892_v28 }
 0x4fe   : > { %3473 = vmatmul.mubr.msk.f32.vlgmr.msra.gmra.mrb[2].mxu0 %vm712_vm0, %v4330_v29 }
 0x4ff   : > { %3497 = vmatprep.mubr.msk.f32.mxu0 %vm3953_vm1, %v3954_v36 }
 0x5d1   : > { %v978_v31 = vpop.f32.mrb[2].mxu0 }
 0x5d2   : > { %v4339_v32 = vadd.f32 %v3221_v30, %v978_v31  ;;  %v3474_v33 = vpop.f32.mrb[3].mxu0 }
 0x5d3   : > { %v1660_v33 = vld [vmem:[%s4764_s9 + $0x8] sm:$0xff] }
 0x5d4   : > { %983 = vrot.lane.b32.xlu1 %v4339_v32, %s3955_s0 }
 0x646   : > { %v984_v34 = vpop.permute.xlu1 %983 }
 0x647   : > { %3476 = vmatpush3.xpose.msk.msra.mxu1 %vm985_vm8, %v984_v34 }
 0x648   : > { %3480 = vmatprep.subr.mxu1 %v3954_v36 }
 0x64a   : > { %3478 = vmatmul.mubr.msk.f32.vlgmr.msra.gmra.mrb[2].mxu1 %vm985_vm8, %v4339_v32 }
 0x64b   : > { %3482 = vmatprep.mubr.msk.f32.mxu1 %vm3953_vm1, %v3954_v36 }
 0x71d   : > { %v1056_v35 = vpop.f32.mrb[2].mxu1 }
 0x71e   : > { %v3479_v37 = vpop.f32.mrb[3].mxu1  ;;  %v1060_v38 = vsel %vm985_vm8, %v1056_v35, -inf }
 0x71f   : > { %1061 = vmax.xlane.f32.xlu0 %v1060_v38  ;;  %v1662_v37 = vld [vmem:[%s4764_s9 + $0x18] sm:$0xff] }
 0x735   : > { %1071 = vrot.lane.b32.xlu0 %v4339_v32, %s4784_s22  ;;  %s4790_s22 = smov 16  }
 0x739   : > { %1149 = vrot.lane.b32.xlu0 %v4339_v32, %s3958_s24 }
 0x73d   : > { %1147 = vrot.lane.b32.xlu0 %v4339_v32, %s3959_s20 }
 0x741   : > { %1314 = vrot.lane.b32.xlu0 %v4339_v32, %s3960_s2 }
 0x745   : > { %1479 = vrot.lane.b32.xlu0 %v4339_v32, %s3961_s19 }
 0x749   : > { %1477 = vrot.lane.b32.xlu0 %v4339_v32, %s4787_s27 }
 0x7ac   : > { %v1062_v39 = vpop.xlane.xlu0 %1061 }
 0x7ad   : > { %v1063_v40 = vsub.f32 %v1056_v35, %v1062_v39  ;;  %v1661_v35 = vld [vmem:[%s4764_s9 + $0x10] sm:$0xff] }
 0x7ae   : > { %v3725_v38 = vpack.c.bf16 %v1662_v37, %v1661_v35 }
 0x7af   : > { %v1064_v41 = vmul.f32 1.442695, %v1063_v40 }
 0x7b0   : > { %v1072_v42 = vpop.permute.xlu0 %1071 }
 0x7b1   : > { %3844 = vpow2.f32 %v1064_v41  ;;  %3481 = vmatpush3.msra.mxu1 %v1072_v42 }
 0x7b2   : > { %3485 = vmatprep.subr.mxu1 %v3954_v36 }
 0x7b4   : > { %v1150_v43 = vpop.permute.xlu0 %1149 }
 0x7b8   : > { %v1148_v44 = vpop.permute.xlu0 %1147 }
 0x7bb   : > { %v3845_v45 = vpop.eup %3844 }
 0x7bc   : > { %v1315_v46 = vpop.permute.xlu0 %1314  ;;  %v1066_v47 = vsel %vm985_vm8, %v3845_v45, 0.0 }
 0x7bd   : > { %1067 = vadd.xlane.f32.xlu1 %v1066_v47  ;;  %3496 = vmatpush3.xpose.msk.msra.mxu0 %vm985_vm8, %v1315_v46 }
 0x7be   : > { %3505 = vmatprep.subr.mxu0 %v3954_v36 }
 0x7c0   : > { %v1480_v49 = vpop.permute.xlu0 %1479 }
 0x7c4   : > { %v1478_v51 = vpop.permute.xlu0 %1477 }
 0x7ce   : > { %1312 = vrot.lane.b32.xlu1 %v4339_v32, %s4788_s21  ;;  %s4819_s21 = sld [smem:[#allocation15_spill]] }
 0x84a   : > { %v1068_v48 = vpop.xlane.xlu1 %1067 }
 0x84b   : > { %3846 = vrcp.f32 %v1068_v48 }
 0x84e   : > { %v1313_v50 = vpop.permute.xlu1 %1312 }
 0x84f   : > { %3498 = vmatmul.mubr.msk.f32.vlgmr.msra.gmra.mrb[4].mxu0 %vm985_vm8, %v1313_v50 }
 0x850   : > { %3506 = vmatpush3.xpose.msk.msra.mxu0 %vm985_vm8, %v1480_v49  ;;  %3507 = vmatprep.mubr.msk.f32.mxu0 %vm3953_vm1, %v3954_v36 }
 0x851   : > { %3721 = vmatprep.subr.bf16.mxu0 %v3952_v0 }
 0x853   : > { %3508 = vmatmul.mubr.msk.f32.vlgmr.msra.gmra.mrb[6].mxu0 %vm985_vm8, %v1478_v51  ;;  %v3235_v51 = vld [vmem:[%s4765_s10] ss:$0 sm:$0xff] }
 0x854   : > { %3523 = vmatprep.mubr.msk.f32.mxu0 %vm3953_vm1, %v3954_v36 }
 0x855   : > { %v3847_v52 = vpop.eup %3846 }
 0x856   : > { %v1070_v53 = vmul.f32 %v3847_v52, %v3845_v45 }
 0x858   : > { %3483 = vmatmul.mubr.msk.f32.vlgmr.msra.gmra.mrb[4].mxu1 %vm985_vm8, %v1070_v53 }
 0x859   : > { %3486 = vmatpush3.xpose.msk.msra.mxu1 %vm985_vm8, %v1150_v43  ;;  %3487 = vmatprep.mubr.msk.f32.mxu1 %vm3953_vm1, %v3954_v36 }
 0x85a   : > { %3490 = vmatprep.subr.mxu1 %v3954_v36 }
 0x85c   : > { %3488 = vmatmul.mubr.msk.f32.vlgmr.msra.gmra.mrb[6].mxu1 %vm985_vm8, %v1148_v44 }
 0x85d   : > { %3492 = vmatprep.mubr.msk.f32.mxu1 %vm3953_vm1, %v3954_v36 }
 0x922   : > { %v1386_v54 = vpop.f32.mrb[4].mxu0 }
 0x923   : > { %v3499_v55 = vpop.f32.mrb[5].mxu0  ;;  %v1390_v56 = vsel %vm985_vm8, %v1386_v54, -inf }
 0x924   : > { %1391 = vmax.xlane.f32.xlu1 %v1390_v56 }
 0x926   : > { %v1551_v57 = vpop.f32.mrb[6].mxu0 }
 0x927   : > { %v3509_v58 = vpop.f32.mrb[7].mxu0  ;;  %v1555_v1 = vsel %vm985_vm8, %v1551_v57, -inf }
 0x92b   : > { %v4385_v59 = vpop.f32.mrb[4].mxu1 }
 0x92c   : > { %v3484_v60 = vpop.f32.mrb[5].mxu1 }
 0x92f   : > { %v1221_v61 = vpop.f32.mrb[6].mxu1 }
 0x930   : > { %v3489_v62 = vpop.f32.mrb[7].mxu1  ;;  %v1225_v63 = vsel %vm985_vm8, %v1221_v61, -inf }
 0x931   : > { %1226 = vmax.xlane.f32.xlu0 %v1225_v63  ;;  %v1768_v62 = vld [vmem:[%s4767_s12] sm:$0xff]  ;;  %v1769_v63 = vld [vmem:[%s4767_s12 + $0x8] sm:$0xff] }
 0x935   : > { %1236 = vrot.lane.b32.xlu1 %v4339_v32, %s4786_s26  ;;  %1556 = vmax.xlane.f32.xlu0 %v1555_v1  ;;  %s4789_s26 = smov 24   ;;  %v3728_v1 = vpack.c.bf16 %v1769_v63, %v1768_v62  ;;  %v1950_v63 = vld [vmem:[%s4771_s16] sm:$0x3] }
 0x939   : > { %1566 = vrot.lane.b32.xlu1 %v4339_v32, %s4783_s28  ;;  %s3288_s28 = sshll.u32 %s4092_s1, 4  ;;  %s3970_s1 = smov [#allocation2]  }
 0x93a   : > { %s3892_s25 = sshll.u32 %s3970_s1, 4  ;;  %s3893_s25 = int_to_ptr.vmem [resolvable:$false] %s3892_s25 }
 0x93b   : > { %s3894_s27 = scalar_lea.vmem %s3893_s25, 32 }
 0x9b1   : > { %v1392_v2 = vpop.xlane.xlu1 %1391 }
 0x9b2   : > { %v1393_v3 = vsub.f32 %v1386_v54, %v1392_v2  ;;  %v1771_v2 = vld [vmem:[%s4767_s12 + $0x18] sm:$0xff] }
 0x9b4   : > { %v1394_v4 = vmul.f32 1.442695, %v1393_v3 }
 0x9b5   : > { %v1237_v5 = vpop.permute.xlu1 %1236 }
 0x9b6   : > { %3848 = vpow2.f32 %v1394_v4  ;;  %3491 = vmatpush3.msra.mxu1 %v1237_v5 }
 0x9b7   : > { %3500 = vmatprep.subr.mxu1 %v3954_v36 }
 0x9b9   : > { %v1567_v30 = vpop.permute.xlu1 %1566 }
 0x9be   : > { %v1227_v6 = vpop.xlane.xlu0 %1226 }
 0x9bf   : > { %v1228_v8 = vsub.f32 %v1221_v61, %v1227_v6 }
 0x9c0   : > { %v3849_v7 = vpop.eup %3848 }
 0x9c1   : > { %v1396_v9 = vsel %vm985_vm8, %v3849_v7, 0.0  ;;  %v1229_v12 = vmul.f32 1.442695, %v1228_v8 }
 0x9c2   : > { %1397 = vadd.xlane.f32.xlu0 %v1396_v9  ;;  %v1557_v10 = vpop.xlane.xlu0 %1556 }
 0x9c3   : > { %v1558_v11 = vsub.f32 %v1551_v57, %v1557_v10 }
 0x9c5   : > { %v1559_v13 = vmul.f32 1.442695, %v1558_v11 }
 0x9c7   : > { %3850 = vpow2.f32 %v1559_v13 }
 0x9c8   : > { %3852 = vpow2.f32 %v1229_v12 }
 0x9d1   : > { %v3851_v14 = vpop.eup %3850 }
 0x9d2   : > { %v1561_v15 = vsel %vm985_vm8, %v3851_v14, 0.0  ;;  %v3853_v16 = vpop.eup %3852 }
 0x9d3   : > { %1562 = vadd.xlane.f32.xlu0 %v1561_v15  ;;  %v1231_v17 = vsel %vm985_vm8, %v3853_v16, 0.0  ;;  %v1862_v15 = vld [vmem:[%s4769_s14 + $0x8] sm:$0xff] }
 0x9d7   : > { %1232 = vadd.xlane.f32.xlu0 %v1231_v17  ;;  %v1863_v17 = vld [vmem:[%s4769_s14 + $0x10] sm:$0xff] }
 0x9ed   : > { %1401 = vrot.lane.b32.xlu0 %v4339_v32, %s4785_s23  ;;  %v1659_v32 = vld [vmem:[%s4764_s9] sm:$0xff] }
 0x9ee   : > { %v3722_v34 = vpack.c.bf16 %v1660_v33, %v1659_v32 }
 0x9f0   : > { %3723 = vmatpush3.bf16.msra.mxu0 %v3722_v34 }
 0x9f1   : > { %3724 = vmatprep.subr.bf16.mxu0 %v3952_v0 }
 0x9f4   : > { %3726 = vmatpush3.bf16.msra.mxu0 %v3725_v38 }
 0x9f5   : > { %3733 = vmatprep.subr.bf16.mxu0 %v3952_v0 }
 0xa4f   : > { %v1398_v18 = vpop.xlane.xlu0 %1397 }
 0xa60   : > { %v1563_v19 = vpop.xlane.xlu0 %1562 }
 0xa64   : > { %v1233_v20 = vpop.xlane.xlu0 %1232 }
 0xa65   : > { %3854 = vrcp.f32 %v1233_v20  ;;  %v1865_v20 = vld [vmem:[%s4769_s14 + $0x20] sm:$0xff] }
 0xa66   : > { %3856 = vrcp.f32 %v1398_v18  ;;  %v1864_v18 = vld [vmem:[%s4769_s14 + $0x18] sm:$0xff] }
 0xa67   : > { %3858 = vrcp.f32 %v1563_v19  ;;  %v3737_v19 = vpack.c.bf16 %v1864_v18, %v1863_v17 }
 0xa68   : > { %v1402_v25 = vpop.permute.xlu0 %1401 }
 0xa6f   : > { %v3855_v21 = vpop.eup %3854 }
 0xa70   : > { %v1235_v22 = vmul.f32 %v3855_v21, %v3853_v16  ;;  %v3857_v23 = vpop.eup %3856  ;;  %v1866_v21 = vld [vmem:[%s4769_s14 + $0x28] sm:$0xff] }
 0xa71   : > { %v1400_v27 = vmul.f32 %v3857_v23, %v3849_v7  ;;  %v3859_v28 = vpop.eup %3858  ;;  %v1744_v7 = vld [vmem:[%s4766_s11] sm:$0x3]  ;;  %v1867_v23 = vld [vmem:[%s4769_s14 + $0x30] sm:$0xff] }
 0xa72   : > { %3493 = vmatmul.mubr.msk.f32.vlgmr.msra.gmra.mrb[8].mxu1 %vm985_vm8, %v1235_v22  ;;  %v1565_v31 = vmul.f32 %v3859_v28, %v3851_v14  ;;  %v1761_v8 = vrot.slane %v1744_v7, %v4280_v24  ;;  %v1766_v11 = vrot.slane %v1744_v7, %v4285_v26  ;;  %v1861_v14 = vld [vmem:[%s4769_s14] sm:$0xff]  ;;  %v3740_v22 = vpack.c.bf16 %v1866_v21, %v1865_v20 }
 0xa73   : > { %3501 = vmatpush3.msra.mxu1 %v1402_v25  ;;  %3502 = vmatprep.mubr.msk.f32.mxu1 %vm3953_vm1, %v3954_v36  ;;  %v3734_v16 = vpack.c.bf16 %v1862_v15, %v1861_v14  ;;  %v1868_v25 = vld [vmem:[%s4769_s14 + $0x38] sm:$0xff]  ;;  %v3237_v28 = vld [vmem:[%s4768_s13] ss:$0 sm:$0xff] }
 0xa74   : > { %3510 = vmatprep.subr.mxu1 %v3954_v36 }
 0xa76   : > { %3503 = vmatmul.mubr.msk.f32.vlgmr.msra.gmra.mrb[10].mxu1 %vm985_vm8, %v1400_v27  ;;  %v3743_v27 = vpack.c.bf16 %v1868_v25, %v1867_v23 }
 0xa77   : > { %3511 = vmatpush3.msra.mxu1 %v1567_v30  ;;  %3512 = vmatprep.mubr.msk.f32.mxu1 %vm3953_vm1, %v3954_v36 }
 0xa78   : > { %3727 = vmatprep.subr.bf16.mxu1 %v3952_v0 }
 0xa7a   : > { %3513 = vmatmul.mubr.msk.f32.vlgmr.msra.gmra.mrb[12].mxu1 %vm985_vm8, %v1565_v31 }
 0xa7b   : > { %3534 = vmatprep.mubr.msk.f32.mxu1 %vm3953_vm1, %v3954_v36  ;;  %3729 = vmatpush3.bf16.msra.mxu1 %v3728_v1  ;;  %v1967_v1 = vrot.slane %v1950_v63, %v4280_v24 }
 0xa7c   : > { %3730 = vmatprep.subr.bf16.mxu1 %v3952_v0 }
 0xb45   : > { %v1308_v39 = vpop.f32.mrb[8].mxu1 }
 0xb46   : > { %1643 = vrot.lane.b32.xlu1 %v1308_v39, %s4791_s18  ;;  %v3494_v40 = vpop.f32.mrb[9].mxu1  ;;  %s4810_s18 = smov 112  }
 0xb49   : > { %v1473_v41 = vpop.f32.mrb[10].mxu1 }
 0xb4a   : > { %1647 = vrot.lane.b32.xlu1 %v1473_v41, %s4790_s22  ;;  %v3504_v42 = vpop.f32.mrb[11].mxu1  ;;  %s4811_s22 = smov 104  }
 0xb4d   : > { %v1638_v43 = vpop.f32.mrb[12].mxu1 }
 0xb4e   : > { %1651 = vrot.lane.b32.xlu0 %v1638_v43, %s4789_s26  ;;  %v3514_v44 = vpop.f32.mrb[13].mxu1  ;;  %v3239_v43 = vld [vmem:[%s4770_s15] ss:$0 sm:$0xff]  ;;  %s593_s26 = sand.u32 1, %s3942_s30  }
 0xb4f   : > { %s594_s23 = scalar_lea.vmem [#allocation2], %s593_s26 }
 0xbb8   : > { %v1644_v45 = vpop.permute.xlu1 %1643 }
 0xbb9   : > { %v1654_v47 = vsel %vm985_vm8, %v4385_v59, %v1644_v45 }
 0xbbc   : > { %v1648_v46 = vpop.permute.xlu1 %1647 }
 0xbbd   : > { %v1656_v48 = vsel %vm1655_vm9, %v1654_v47, %v1648_v46 }
 0xbc0   : > { %v1652_v49 = vpop.permute.xlu0 %1651 }
 0xbc1   : > { %v1658_v50 = vsel %vm1657_vm10, %v1656_v48, %v1652_v49 }
 0xbc2   : > { %3524 = vmatmul.mubr.msk.f32.vlgmr.msra.gmra.mrb[8].mxu0 %vm712_vm0, %v1658_v50 }
 0xbc3   : > { %3553 = vmatprep.mubr.msk.f32.mxu0 %vm3953_vm1, %v3954_v36  ;;  %3735 = vmatpush3.bf16.msra.mxu0 %v3734_v16 }
 0xbc4   : > { %3736 = vmatprep.subr.bf16.mxu0 %v3952_v0 }
 0xbc7   : > { %3738 = vmatpush3.bf16.msra.mxu0 %v3737_v19 }
 0xbc8   : > { %3739 = vmatprep.subr.bf16.mxu0 %v3952_v0 }
 0xbcb   : > { %3741 = vmatpush3.bf16.msra.mxu0 %v3740_v22 }
 0xbcc   : > { %3742 = vmatprep.subr.bf16.mxu0 %v3952_v0 }
 0xbcf   : > { %3744 = vmatpush3.bf16.msra.mxu0 %v3743_v27 }
 0xbd0   : > { %3577 = vmatprep.subr.mxu0 %v3954_v36 }
 0xc95   : > { %v1739_v52 = vpop.f32.mrb[8].mxu0 }
 0xc96   : > { %v1740_v53 = vadd.f32 %v3235_v51, %v1739_v52  ;;  %v3525_v54 = vpop.f32.mrb[9].mxu0 }
 0xc97   : > { %v3241_v54 = vld [vmem:[%s4762_s7 + $0x20] sm:$0xff] }
 0xc98   : > { %v1743_v55 = vadd.f32 %v1740_v53, %v4330_v29  ;;  %v1770_v29 = vld [vmem:[%s4767_s12 + $0x10] sm:$0xff] }
 0xc99   : > { %v3731_v3 = vpack.c.bf16 %v1771_v2, %v1770_v29 }
 0xc9a   : > { %v1745_v56 = vsel %vm712_vm0, %v1743_v55, 0.0 }
 0xc9b   : > { %1746 = vadd.xlane.f32.xlu1 %v1745_v56  ;;  %3732 = vmatpush3.bf16.msra.mxu1 %v3731_v3  ;;  %v1972_v3 = vrot.slane %v1950_v63, %v4285_v26 }
 0xc9c   : > { %3745 = vmatprep.subr.bf16.mxu1 %v3952_v0 }
 0xd28   : > { %v1747_v57 = vpop.xlane.xlu1 %1746 }
 0xd29   : > { %v1748_v58 = vmul.f32 0.03125, %v1747_v57  ;;  %v3243_v57 = vld [vmem:[%s4762_s7 + $0x30] sm:$0xff] }
 0xd2b   : > { %v1749_v59 = vsub.f32 %v1743_v55, %v1748_v58  ;;  %v3242_v55 = vld [vmem:[%s4762_s7 + $0x28] sm:$0xff]  ;;  %v3244_v58 = vld [vmem:[%s4762_s7 + $0x38] sm:$0xff] }
 0xd2c   : > { %v3746_v56 = vpack.c.bf16 %v3242_v55, %v3241_v54 }
 0xd2d   : > { %v1750_v60 = vmul.f32 %v1749_v59, %v1749_v59 }
 0xd2f   : > { %v1751_v61 = vsel %vm712_vm0, %v1750_v60, 0.0 }
 0xd30   : > { %1752 = vadd.xlane.f32.xlu0 %v1751_v61 }
 0xdbd   : > { %v1753_v4 = vpop.xlane.xlu0 %1752 }
 0xdbe   : > { %v1754_v5 = vmul.f32 0.03125, %v1753_v4 }
 0xdc0   : > { %v1755_v6 = vadd.f32 1e-05, %v1754_v5 }
 0xdc2   : > { %3860 = vrsqrt.f32 %v1755_v6  ;;  %v3246_v6 = vld [vmem:[%s4763_s8 + $0x1] ss:$0 sm:$0xff] }
 0xdcc   : > { %v3861_v9 = vpop.eup %3860 }
 0xdcd   : > { %v1757_v10 = vmul.f32 %v3861_v9, %v1749_v59  ;;  %v3749_v59 = vpack.c.bf16 %v3244_v58, %v3243_v57 }
 0xdcf   : > { %v1762_v12 = vmul.f32 %v1761_v8, %v1757_v10 }
 0xdd1   : > { %v1767_v13 = vadd.f32 %v1766_v11, %v1762_v12 }
 0xdd3   : > { %3535 = vmatmul.mubr.msk.f32.vlgmr.msra.gmra.mrb[14].mxu1 %vm712_vm0, %v1767_v13 }
 0xdd4   : > { %3564 = vmatprep.mubr.msk.f32.mxu1 %vm3953_vm1, %v3954_v36  ;;  %3747 = vmatpush3.bf16.msra.mxu1 %v3746_v56 }
 0xdd5   : > { %3748 = vmatprep.subr.bf16.mxu1 %v3952_v0 }
 0xdd8   : > { %3750 = vmatpush3.bf16.msra.mxu1 %v3749_v59 }
 0xdd9   : > { %3567 = vmatprep.subr.mxu1 %v3954_v36 }
 0xea6   : > { %v1848_v30 = vpop.f32.mrb[14].mxu1 }
 0xea7   : > { %v1849_v31 = vadd.f32 %v3237_v28, %v1848_v30  ;;  %v3536_v32 = vpop.f32.mrb[15].mxu1 }
 0xea9   : > { %v1852_v33 = vmul.f32 %v1849_v31, %v1849_v31 }
 0xeab   : > { %v1853_v34 = vmul.f32 %v1852_v33, %v1849_v31 }
 0xead   : > { %v1854_v35 = vmul.f32 0.044715, %v1853_v34 }
 0xeaf   : > { %v1855_v37 = vadd.f32 %v1854_v35, %v1849_v31 }
 0xeb1   : > { %v1856_v38 = vmul.f32 0.7978846, %v1855_v37 }
 0xeb3   : > { %3862 = vtanh.f32 %v1856_v38 }
 0xebd   : > { %v3863_v39 = vpop.eup %3862 }
 0xebe   : > { %v1858_v40 = vadd.f32 1.0, %v3863_v39 }
 0xec0   : > { %v1859_v41 = vmul.f32 0.5, %v1858_v40 }
 0xec2   : > { %v1860_v42 = vmul.f32 %v1859_v41, %v1849_v31 }
 0xec4   : > { %3554 = vmatmul.mubr.msk.f32.vlgmr.msra.gmra.mrb[10].mxu0 %vm767_vm6, %v1860_v42 }
 0xec5   : > { %3579 = vmatprep.mubr.msk.f32.mxu0 %vm3953_vm1, %v3954_v36 }
 0xf97   : > { %v1945_v44 = vpop.f32.mrb[10].mxu0 }
 0xf98   : > { %v1946_v45 = vadd.f32 %v3239_v43, %v1945_v44  ;;  %v3555_v46 = vpop.f32.mrb[11].mxu0 }
 0xf9a   : > { %v1949_v47 = vadd.f32 %v1946_v45, %v1767_v13 }
 0xf9c   : > { %v1951_v48 = vsel %vm712_vm0, %v1949_v47, 0.0 }
 0xf9d   : > { %1952 = vadd.xlane.f32.xlu0 %v1951_v48 }
0x102a   : > { %v1953_v49 = vpop.xlane.xlu0 %1952 }
0x102b   : > { %v1954_v50 = vmul.f32 0.03125, %v1953_v49 }
0x102d   : > { %v1955_v51 = vsub.f32 %v1949_v47, %v1954_v50 }
0x102f   : > { %v1956_v52 = vmul.f32 %v1955_v51, %v1955_v51 }
0x1031   : > { %v1957_v53 = vsel %vm712_vm0, %v1956_v52, 0.0 }
0x1032   : > { %1958 = vadd.xlane.f32.xlu0 %v1957_v53 }
0x10bf   : > { %v1959_v60 = vpop.xlane.xlu0 %1958 }
0x10c0   : > { %v1960_v61 = vmul.f32 0.03125, %v1959_v60 }
0x10c2   : > { %v1961_v62 = vadd.f32 1e-05, %v1960_v61 }
0x10c4   : > { %3864 = vrsqrt.f32 %v1961_v62 }
0x10ce   : > { %v3865_v29 = vpop.eup %3864 }
0x10cf   : > { %v1963_v2 = vmul.f32 %v3865_v29, %v1955_v51 }
0x10d1   : > { %v1968_v4 = vmul.f32 %v1967_v1, %v1963_v2 }
0x10d3   : > { %v4520_v5 = vadd.f32 %v1972_v3, %v1968_v4 }
0x10d5   : > { %3565 = vmatmul.mubr.msk.f32.vlgmr.msra.gmra.mrb[16].mxu1 %vm712_vm0, %v4520_v5 }
0x10d6   : > { %3569 = vmatprep.mubr.msk.f32.mxu1 %vm3953_vm1, %v3954_v36 }
0x11a8   : > { %v2056_v7 = vpop.f32.mrb[16].mxu1 }
0x11a9   : > { %v4529_v8 = vadd.f32 %v3246_v6, %v2056_v7  ;;  %v3566_v9 = vpop.f32.mrb[17].mxu1  ;;  %v3260_v6 = vld [vmem:[%s4764_s9 + $0x20] sm:$0xff]  ;;  %v3261_v7 = vld [vmem:[%s4764_s9 + $0x28] sm:$0xff] }
0x11aa   : > { %v3752_v9 = vpack.c.bf16 %v3261_v7, %v3260_v6 }
0x11ab   : > { %2226 = vrot.lane.b32.xlu0 %v4529_v8, %s3958_s24  ;;  %2061 = vrot.lane.b32.xlu1 %v4529_v8, %s3955_s0  ;;  %s4812_s0 = smov 56   ;;  %s4813_s24 = smov 48  }
0x11af   : > { %2556 = vrot.lane.b32.xlu0 %v4529_v8, %s3961_s19  ;;  %2224 = vrot.lane.b32.xlu1 %v4529_v8, %s3959_s20  ;;  %s4814_s20 = smov 64  }
0x11b3   : > { %2391 = vrot.lane.b32.xlu1 %v4529_v8, %s3960_s2  ;;  %s4815_s2 = smov 40  }
0x11b7   : > { %2389 = vrot.lane.b32.xlu1 %v4529_v8, %s4810_s18  ;;  %s3158_s18 = sshll.u32 %s594_s23, 4  ;;  %s4715_s18 = int_to_ptr.vmem [resolvable:$true] %s3158_s18 }
0x11b8   : > { %s3888_s19 = scalar_lea.vmem %s4715_s18, 16  ;;  %p3895_p0 = scmp.lt.s32.totalorder %s4715_s18, %s3893_s25 }
0x11b9   : > { %p3889_p11 = scmp.ne.s32.totalorder %s4715_s18, %s3888_s19  ;;  %p3896_p1 = scmp.lt.s32.totalorder %s3894_s27, %s3888_s19 }
0x11bb   : > { %2554 = vrot.lane.b32.xlu1 %v4529_v8, %s4811_s22  ;;  %s4816_s22 = smov 8   ;;  %p3890_p12 = pnand %p3889_p11, %p4109_p5 }
0x11bc   : > { %p3897_p2 = por %p3896_p1, %p3895_p0 }
0x11bd   : > { %p3891_p13 = pneg %p3890_p12 }
0x11bf   : > { %p3898_p3 = pnand %p3897_p2, %p3891_p13 }
0x121d   : > { %v2227_v10 = vpop.permute.xlu0 %2226  ;;  %v2062_v11 = vpop.permute.xlu1 %2061 }
0x121e   : > { %3568 = vmatpush3.xpose.msk.msra.mxu1 %vm985_vm8, %v2062_v11  ;;  %3578 = vmatpush3.xpose.msk.msra.mxu0 %vm985_vm8, %v2227_v10  ;;  %v3263_v10 = vld [vmem:[%s4764_s9 + $0x38] sm:$0xff] }
0x121f   : > { %3587 = vmatprep.subr.mxu0 %v3954_v36  ;;  %3572 = vmatprep.subr.mxu1 %v3954_v36 }
0x1221   : > { %3570 = vmatmul.mubr.msk.f32.vlgmr.msra.gmra.mrb[18].mxu1 %vm985_vm8, %v4529_v8  ;;  %v2225_v12 = vpop.permute.xlu1 %2224  ;;  %v2557_v15 = vpop.permute.xlu0 %2556 }
0x1222   : > { %3580 = vmatmul.mubr.msk.f32.vlgmr.msra.gmra.mrb[12].mxu0 %vm985_vm8, %v2225_v12  ;;  %3574 = vmatprep.mubr.msk.f32.mxu1 %vm3953_vm1, %v3954_v36 }
0x1223   : > { %3589 = vmatprep.mubr.msk.f32.mxu0 %vm3953_vm1, %v3954_v36 }
0x1225   : > { %v2392_v13 = vpop.permute.xlu1 %2391 }
0x1226   : > { %3588 = vmatpush3.xpose.msk.msra.mxu0 %vm985_vm8, %v2392_v13 }
0x1227   : > { %3597 = vmatprep.subr.mxu0 %v3954_v36 }
0x1229   : > { %v2390_v14 = vpop.permute.xlu1 %2389 }
0x122a   : > { %3590 = vmatmul.mubr.msk.f32.vlgmr.msra.gmra.mrb[14].mxu0 %vm985_vm8, %v2390_v14 }
0x122b   : > { %3598 = vmatpush3.xpose.msk.msra.mxu0 %vm985_vm8, %v2557_v15  ;;  %3599 = vmatprep.mubr.msk.f32.mxu0 %vm3953_vm1, %v3954_v36 }
0x122c   : > { %3751 = vmatprep.subr.bf16.mxu0 %v3952_v0 }
0x122d   : > { %v2555_v16 = vpop.permute.xlu1 %2554 }
0x122e   : > { %3600 = vmatmul.mubr.msk.f32.vlgmr.msra.gmra.mrb[16].mxu0 %vm985_vm8, %v2555_v16 }
0x122f   : > { %3615 = vmatprep.mubr.msk.f32.mxu0 %vm3953_vm1, %v3954_v36  ;;  %3753 = vmatpush3.bf16.msra.mxu0 %v3752_v9 }
0x1230   : > { %3754 = vmatprep.subr.bf16.mxu0 %v3952_v0 }
0x12f4   : > { %v2133_v17 = vpop.f32.mrb[18].mxu1 }
0x12f5   : > { %v3571_v18 = vpop.f32.mrb[19].mxu1  ;;  %v2298_v19 = vpop.f32.mrb[12].mxu0  ;;  %v2137_v20 = vsel %vm985_vm8, %v2133_v17, -inf }
0x12f6   : > { %v3581_v21 = vpop.f32.mrb[13].mxu0  ;;  %2138 = vmax.xlane.f32.xlu0 %v2137_v20  ;;  %v2302_v22 = vsel %vm985_vm8, %v2298_v19, -inf }
0x12f7   : > { %2303 = vmax.xlane.f32.xlu1 %v2302_v22 }
0x12fd   : > { %v2463_v23 = vpop.f32.mrb[14].mxu0 }
0x12fe   : > { %v3591_v25 = vpop.f32.mrb[15].mxu0  ;;  %v2467_v27 = vsel %vm985_vm8, %v2463_v23, -inf }
0x12ff   : > { %2468 = vmax.xlane.f32.xlu0 %v2467_v27 }
0x1301   : > { %v2628_v28 = vpop.f32.mrb[16].mxu0 }
0x1302   : > { %v3601_v30 = vpop.f32.mrb[17].mxu0  ;;  %v2632_v31 = vsel %vm985_vm8, %v2628_v28, -inf }
0x1303   : > { %2633 = vmax.xlane.f32.xlu0 %v2632_v31 }
0x1383   : > { %v2139_v32 = vpop.xlane.xlu0 %2138 }
0x1384   : > { %v2140_v33 = vsub.f32 %v2133_v17, %v2139_v32  ;;  %v2304_v34 = vpop.xlane.xlu1 %2303 }
0x1385   : > { %v2305_v35 = vsub.f32 %v2298_v19, %v2304_v34 }
0x1386   : > { %v2141_v37 = vmul.f32 1.442695, %v2140_v33 }
0x1387   : > { %v2306_v38 = vmul.f32 1.442695, %v2305_v35 }
0x1388   : > { %3866 = vpow2.f32 %v2141_v37 }
0x1389   : > { %3868 = vpow2.f32 %v2306_v38 }
0x138c   : > { %v2469_v39 = vpop.xlane.xlu0 %2468 }
0x138d   : > { %v2470_v40 = vsub.f32 %v2463_v23, %v2469_v39 }
0x138f   : > { %v2471_v41 = vmul.f32 1.442695, %v2470_v40 }
0x1390   : > { %v2634_v48 = vpop.xlane.xlu0 %2633 }
0x1391   : > { %3870 = vpow2.f32 %v2471_v41  ;;  %v2635_v49 = vsub.f32 %v2628_v28, %v2634_v48  ;;  %v3265_v28 = vld [vmem:[%s4765_s10 + $0x1] ss:$0 sm:$0xff] }
0x1392   : > { %v3867_v42 = vpop.eup %3866  ;;  %v3268_v41 = vld [vmem:[%s4767_s12 + $0x20] sm:$0xff] }
0x1393   : > { %v3869_v43 = vpop.eup %3868  ;;  %v2143_v44 = vsel %vm985_vm8, %v3867_v42, 0.0  ;;  %v2636_v50 = vmul.f32 1.442695, %v2635_v49  ;;  %v3267_v49 = vld [vmem:[%s4766_s11 + $0x2] sm:$0x3] }
0x1394   : > { %2144 = vadd.xlane.f32.xlu0 %v2143_v44  ;;  %v2308_v45 = vsel %vm985_vm8, %v3869_v43, 0.0  ;;  %v3271_v44 = vld [vmem:[%s4767_s12 + $0x38] sm:$0xff] }
0x1395   : > { %2309 = vadd.xlane.f32.xlu1 %v2308_v45  ;;  %3872 = vpow2.f32 %v2636_v50  ;;  %v2839_v50 = vrot.slane %v3267_v49, %v4280_v24 }
0x139b   : > { %v3871_v46 = vpop.eup %3870 }
0x139c   : > { %v2473_v47 = vsel %vm985_vm8, %v3871_v46, 0.0 }
0x139d   : > { %2474 = vadd.xlane.f32.xlu0 %v2473_v47 }
0x139f   : > { %v3873_v51 = vpop.eup %3872 }
0x13a0   : > { %v2638_v52 = vsel %vm985_vm8, %v3873_v51, 0.0 }
0x13a6   : > { %2313 = vrot.lane.b32.xlu1 %v4529_v8, %s4812_s0  ;;  %s4817_s0 = smov 16  }
0x13aa   : > { %2478 = vrot.lane.b32.xlu1 %v4529_v8, %s4813_s24  ;;  %s4818_s24 = smov 24  }
0x13b3   : > { %2148 = vrot.lane.b32.xlu0 %v4529_v8, %s4814_s20 }
0x13ce   : > { %2639 = vadd.xlane.f32.xlu1 %v2638_v52 }
0x13df   : > { %2643 = vrot.lane.b32.xlu1 %v4529_v8, %s4815_s2  ;;  %v3262_v8 = vld [vmem:[%s4764_s9 + $0x30] sm:$0xff]  ;;  %s3146_s2 = scalar_lea.sflag [#allocation3], %s593_s26 }
0x13e0   : > { %v3755_v11 = vpack.c.bf16 %v3263_v10, %v3262_v8 }
0x13e2   : > { %3756 = vmatpush3.bf16.msra.mxu0 %v3755_v11 }
0x13e3   : > { %3763 = vmatprep.subr.bf16.mxu0 %v3952_v0 }
0x1421   : > { %v2145_v53 = vpop.xlane.xlu0 %2144 }
0x1422   : > { %3874 = vrcp.f32 %v2145_v53  ;;  %v2310_v54 = vpop.xlane.xlu1 %2309  ;;  %v2844_v53 = vrot.slane %v3267_v49, %v4285_v26 }
0x1423   : > { %3876 = vrcp.f32 %v2310_v54 }
0x1426   : > { %v2314_v58 = vpop.permute.xlu1 %2313 }
0x142a   : > { %v2475_v55 = vpop.xlane.xlu0 %2474  ;;  %v2479_v62 = vpop.permute.xlu1 %2478 }
0x142b   : > { %3878 = vrcp.f32 %v2475_v55 }
0x142c   : > { %v3875_v56 = vpop.eup %3874 }
0x142d   : > { %v2147_v57 = vmul.f32 %v3875_v56, %v3867_v42  ;;  %v3877_v60 = vpop.eup %3876  ;;  %v3269_v42 = vld [vmem:[%s4767_s12 + $0x28] sm:$0xff]  ;;  %v3275_v56 = vld [vmem:[%s4769_s14 + $0x40] sm:$0xff] }
0x142e   : > { %v2149_v59 = vpop.permute.xlu0 %2148  ;;  %v2312_v61 = vmul.f32 %v3877_v60, %v3869_v43  ;;  %v3758_v43 = vpack.c.bf16 %v3269_v42, %v3268_v41  ;;  %v3286_v41 = vld [vmem:[%s4771_s16 + $0x2] sm:$0x3] }
0x142f   : > { %3573 = vmatpush3.msra.mxu1 %v2149_v59  ;;  %v3277_v59 = vld [vmem:[%s4769_s14 + $0x50] sm:$0xff]  ;;  %v3050_v42 = vrot.slane %v3286_v41, %v4280_v24  ;;  %v3070_v24 = vld [vmem:[%s4819_s21] sm:$0x1] }
0x1430   : > { %3575 = vmatmul.mubr.msk.f32.vlgmr.msra.gmra.mrb[20].mxu1 %vm985_vm8, %v2147_v57  ;;  %3582 = vmatprep.subr.mxu1 %v3954_v36  ;;  %v3276_v57 = vld [vmem:[%s4769_s14 + $0x48] sm:$0xff] }
0x1431   : > { %3583 = vmatpush3.msra.mxu1 %v2314_v58  ;;  %3584 = vmatprep.mubr.msk.f32.mxu1 %vm3953_vm1, %v3954_v36  ;;  %v3764_v58 = vpack.c.bf16 %v3276_v57, %v3275_v56 }
0x1432   : > { %3592 = vmatprep.subr.mxu1 %v3954_v36 }
0x1434   : > { %3585 = vmatmul.mubr.msk.f32.vlgmr.msra.gmra.mrb[22].mxu1 %vm985_vm8, %v2312_v61  ;;  %v3279_v61 = vld [vmem:[%s4769_s14 + $0x60] sm:$0xff] }
0x1435   : > { %v3879_v63 = vpop.eup %3878  ;;  %3593 = vmatpush3.msra.mxu1 %v2479_v62  ;;  %3594 = vmatprep.mubr.msk.f32.mxu1 %vm3953_vm1, %v3954_v36  ;;  %v3280_v62 = vld [vmem:[%s4769_s14 + $0x68] sm:$0xff] }
0x1436   : > { %v2477_v1 = vmul.f32 %v3879_v63, %v3871_v46  ;;  %3602 = vmatprep.subr.mxu1 %v3954_v36  ;;  %v3770_v63 = vpack.c.bf16 %v3280_v62, %v3279_v61 }
0x1438   : > { %3595 = vmatmul.mubr.msk.f32.vlgmr.msra.gmra.mrb[24].mxu1 %vm985_vm8, %v2477_v1  ;;  %v3281_v1 = vld [vmem:[%s4769_s14 + $0x70] sm:$0xff] }
0x1439   : > { %3604 = vmatprep.mubr.msk.f32.mxu1 %vm3953_vm1, %v3954_v36 }
0x145b   : > { %v2640_v29 = vpop.xlane.xlu1 %2639 }
0x145c   : > { %3880 = vrcp.f32 %v2640_v29  ;;  %v3282_v29 = vld [vmem:[%s4769_s14 + $0x78] sm:$0xff] }
0x145f   : > { %v2644_v2 = vpop.permute.xlu1 %2643 }
0x1460   : > { %3603 = vmatpush3.msra.mxu1 %v2644_v2  ;;  %v3773_v2 = vpack.c.bf16 %v3282_v29, %v3281_v1 }
0x1461   : > { %3757 = vmatprep.subr.bf16.mxu1 %v3952_v0 }
0x1466   : > { %v3881_v3 = vpop.eup %3880 }
0x1467   : > { %v2642_v4 = vmul.f32 %v3881_v3, %v3873_v51  ;;  %v3273_v3 = vld [vmem:[%s4768_s13 + $0x1] ss:$0 sm:$0xff] }
0x1469   : > { %3605 = vmatmul.mubr.msk.f32.vlgmr.msra.gmra.mrb[26].mxu1 %vm985_vm8, %v2642_v4 }
0x146a   : > { %3626 = vmatprep.mubr.msk.f32.mxu1 %vm3953_vm1, %v3954_v36  ;;  %3759 = vmatpush3.bf16.msra.mxu1 %v3758_v43 }
0x146b   : > { %3760 = vmatprep.subr.bf16.mxu1 %v3952_v0 }
0x1503   : > { %v2220_v12 = vpop.f32.mrb[20].mxu1 }
0x1504   : > { %v3576_v13 = vpop.f32.mrb[21].mxu1 }
0x1507   : > { %v2385_v14 = vpop.f32.mrb[22].mxu1 }
0x1508   : > { %2720 = vrot.lane.b32.xlu0 %v2385_v14, %s4816_s22  ;;  %v3586_v15 = vpop.f32.mrb[23].mxu1 }
0x150b   : > { %v2550_v16 = vpop.f32.mrb[24].mxu1 }
0x150c   : > { %2724 = vrot.lane.b32.xlu1 %v2550_v16, %s4817_s0  ;;  %v3596_v17 = vpop.f32.mrb[25].mxu1 }
0x150d   : > { %v3284_v17 = vld [vmem:[%s4770_s15 + $0x1] ss:$0 sm:$0xff] }
0x153c   : > { %v2715_v18 = vpop.f32.mrb[26].mxu1 }
0x153d   : > { %2728 = vrot.lane.b32.xlu0 %v2715_v18, %s4818_s24  ;;  %v3606_v19 = vpop.f32.mrb[27].mxu1  ;;  %s4820_s24 = sld [smem:[#allocation16_spill]] }
0x1543   : > { %s4713_s20 = scalar_lea.hbm %s4820_s24, %s3288_s28 }
0x157a   : > { %v2721_v20 = vpop.permute.xlu0 %2720 }
0x157b   : > { %v2731_v22 = vsel %vm985_vm8, %v2220_v12, %v2721_v20 }
0x157e   : > { %v2725_v21 = vpop.permute.xlu1 %2724 }
0x157f   : > { %v2732_v23 = vsel %vm1655_vm9, %v2731_v22, %v2725_v21 }
0x15af   : > { %v2729_v25 = vpop.permute.xlu0 %2728 }
0x15b0   : > { %v2733_v27 = vsel %vm1657_vm10, %v2732_v23, %v2729_v25 }
0x15b1   : > { %3616 = vmatmul.mubr.msk.f32.vlgmr.msra.gmra.mrb[18].mxu0 %vm712_vm0, %v2733_v27 }
0x15b2   : > { %3645 = vmatprep.mubr.msk.f32.mxu0 %vm3953_vm1, %v3954_v36  ;;  %3765 = vmatpush3.bf16.msra.mxu0 %v3764_v58 }
0x15b3   : > { %3766 = vmatprep.subr.bf16.mxu0 %v3952_v0 }
0x1684   : > { %v2816_v30 = vpop.f32.mrb[18].mxu0 }
0x1685   : > { %v2817_v31 = vadd.f32 %v3265_v28, %v2816_v30  ;;  %v3617_v32 = vpop.f32.mrb[19].mxu0 }
0x1686   : > { %v3067_v32 = vld [vmem:[%s4772_s17 + $0x8] sm:$0xff] }
0x1687   : > { %v2820_v33 = vadd.f32 %v2817_v31, %v4520_v5  ;;  %v3270_v5 = vld [vmem:[%s4767_s12 + $0x30] sm:$0xff]  ;;  %v3066_v31 = vld [vmem:[%s4772_s17] sm:$0xff] }
0x1688   : > { %v3761_v45 = vpack.c.bf16 %v3271_v44, %v3270_v5  ;;  %v3055_v5 = vrot.slane %v3286_v41, %v4285_v26 }
0x1689   : > { %v2823_v34 = vsel %vm712_vm0, %v2820_v33, 0.0 }
0x168a   : > { %2824 = vadd.xlane.f32.xlu1 %v2823_v34  ;;  %3762 = vmatpush3.bf16.msra.mxu1 %v3761_v45  ;;  %v3776_v34 = vpack.c.bf16 %v3067_v32, %v3066_v31 }
0x168b   : > { %3775 = vmatprep.subr.bf16.mxu1 %v3952_v0 }
0x1717   : > { %v2825_v35 = vpop.xlane.xlu1 %2824 }
0x1718   : > { %v2826_v37 = vmul.f32 0.03125, %v2825_v35  ;;  %v3069_v35 = vld [vmem:[%s4772_s17 + $0x18] sm:$0xff] }
0x171a   : > { %v2827_v38 = vsub.f32 %v2820_v33, %v2826_v37  ;;  %v3068_v33 = vld [vmem:[%s4772_s17 + $0x10] sm:$0xff] }
0x171b   : > { %v3779_v37 = vpack.c.bf16 %v3069_v35, %v3068_v33 }
0x171c   : > { %v2828_v39 = vmul.f32 %v2827_v38, %v2827_v38 }
0x171e   : > { %v2829_v40 = vsel %vm712_vm0, %v2828_v39, 0.0 }
0x171f   : > { %2830 = vadd.xlane.f32.xlu0 %v2829_v40 }
0x17ac   : > { %v2831_v46 = vpop.xlane.xlu0 %2830 }
0x17ad   : > { %v2832_v47 = vmul.f32 0.03125, %v2831_v46 }
0x17af   : > { %v2833_v48 = vadd.f32 1e-05, %v2832_v47 }
0x17b1   : > { %3882 = vrsqrt.f32 %v2833_v48 }
0x17bb   : > { %v3883_v51 = vpop.eup %3882 }
0x17bc   : > { %v2835_v52 = vmul.f32 %v3883_v51, %v2827_v38 }
0x17be   : > { %v2840_v54 = vmul.f32 %v2839_v50, %v2835_v52 }
0x17c0   : > { %v2845_v55 = vadd.f32 %v2844_v53, %v2840_v54 }
0x17c2   : > { %3627 = vmatmul.mubr.msk.f32.vlgmr.msra.gmra.mrb[28].mxu1 %vm712_vm0, %v2845_v55 }
0x17c3   : > { %3656 = vmatprep.mubr.msk.f32.mxu1 %vm3953_vm1, %v3954_v36  ;;  %v3278_v36 = vld [vmem:[%s4769_s14 + $0x58] sm:$0xff]  ;;  %3777 = vmatpush3.bf16.msra.mxu1 %v3776_v34 }
0x17c4   : > { %v3767_v60 = vpack.c.bf16 %v3278_v36, %v3277_v59  ;;  %3778 = vmatprep.subr.bf16.mxu1 %v3952_v0 }
0x17c6   : > { %3768 = vmatpush3.bf16.msra.mxu0 %v3767_v60 }
0x17c7   : > { %3769 = vmatprep.subr.bf16.mxu0 %v3952_v0  ;;  %3780 = vmatpush3.bf16.msra.mxu1 %v3779_v37 }
0x17ca   : > { %3771 = vmatpush3.bf16.msra.mxu0 %v3770_v63 }
0x17cb   : > { %3772 = vmatprep.subr.bf16.mxu0 %v3952_v0 }
0x17ce   : > { %3774 = vmatpush3.bf16.msra.mxu0 %v3773_v2 }
0x1895   : > { %v2928_v4 = vpop.f32.mrb[28].mxu1 }
0x1896   : > { %v2929_v6 = vadd.f32 %v3273_v3, %v2928_v4  ;;  %v3628_v7 = vpop.f32.mrb[29].mxu1 }
0x1898   : > { %v2932_v8 = vmul.f32 %v2929_v6, %v2929_v6 }
0x189a   : > { %v2933_v9 = vmul.f32 %v2932_v8, %v2929_v6 }
0x189c   : > { %v2934_v10 = vmul.f32 0.044715, %v2933_v9 }
0x189e   : > { %v2935_v11 = vadd.f32 %v2934_v10, %v2929_v6 }
0x18a0   : > { %v2936_v12 = vmul.f32 0.7978846, %v2935_v11 }
0x18a2   : > { %3884 = vtanh.f32 %v2936_v12 }
0x18ac   : > { %v3885_v13 = vpop.eup %3884 }
0x18ad   : > { %v2938_v14 = vadd.f32 1.0, %v3885_v13 }
0x18af   : > { %v2939_v15 = vmul.f32 0.5, %v2938_v14 }
0x18b1   : > { %v2940_v16 = vmul.f32 %v2939_v15, %v2929_v6 }
0x18b3   : > { %3646 = vmatmul.mubr.msk.f32.vlgmr.msra.gmra.mrb[20].mxu0 %vm767_vm6, %v2940_v16 }
0x1986   : > { %v3027_v18 = vpop.f32.mrb[20].mxu0 }
0x1987   : > { %v3028_v19 = vadd.f32 %v3284_v17, %v3027_v18  ;;  %v3647_v20 = vpop.f32.mrb[21].mxu0 }
0x1989   : > { %v3031_v21 = vadd.f32 %v3028_v19, %v2845_v55 }
0x198b   : > { %v3034_v22 = vsel %vm712_vm0, %v3031_v21, 0.0 }
0x198c   : > { %3035 = vadd.xlane.f32.xlu0 %v3034_v22 }
0x1a19   : > { %v3036_v23 = vpop.xlane.xlu0 %3035 }
0x1a1a   : > { %v3037_v25 = vmul.f32 0.03125, %v3036_v23 }
0x1a1c   : > { %v3038_v27 = vsub.f32 %v3031_v21, %v3037_v25 }
0x1a1e   : > { %v3039_v28 = vmul.f32 %v3038_v27, %v3038_v27 }
0x1a20   : > { %v3040_v30 = vsel %vm712_vm0, %v3039_v28, 0.0 }
0x1a21   : > { %3041 = vadd.xlane.f32.xlu0 %v3040_v30 }
0x1aae   : > { %v3042_v38 = vpop.xlane.xlu0 %3041 }
0x1aaf   : > { %v3043_v39 = vmul.f32 0.03125, %v3042_v38 }
0x1ab1   : > { %v3044_v40 = vadd.f32 1e-05, %v3043_v39 }
0x1ab3   : > { %3886 = vrsqrt.f32 %v3044_v40 }
0x1abd   : > { %v3887_v43 = vpop.eup %3886 }
0x1abe   : > { %v3046_v44 = vmul.f32 %v3887_v43, %v3038_v27 }
0x1ac0   : > { %v3051_v45 = vmul.f32 %v3050_v42, %v3046_v44 }
0x1ac2   : > { %v3056_v46 = vadd.f32 %v3055_v5, %v3051_v45 }
0x1ac4   : > { %v3057_v0 = vsel %vm712_vm0, %v3056_v46, 0.0 }
0x1ac5   : > { %v3058_v47 = vrot.slane %v3057_v0, 4 }
0x1ac7   : > { %v3059_v48 = vadd.f32 %v3058_v47, %v3057_v0 }
0x1ac9   : > { %v3060_v49 = vrot.slane %v3059_v48, 2 }
0x1acb   : > { %v3061_v50 = vadd.f32 %v3060_v49, %v3059_v48 }
0x1acd   : > { %v3062_v51 = vrot.slane %v3061_v50, 1 }
0x1acf   : > { %v3063_v52 = vadd.f32 %v3062_v51, %v3061_v50 }
0x1ad1   : > { %v3065_v53 = vmul.f32 0.125, %v3063_v52 }
0x1ad3   : > { %3657 = vmatmul.mubr.msk.f32.vlgmr.msra.gmra.mrb[30].mxu1 %vm712_vm0, %v3065_v53 }
0x1ba6   : > { %v3140_v26 = vpop.f32.mrb[30].mxu1 }
0x1ba7   : > { %v3141_v54 = vadd.f32 %v3140_v26, %v3070_v24  ;;  %v3658_v55 = vpop.f32.mrb[31].mxu1 }
0x1ba9   : > { %3144 = vst [vmem:[%s594_s23] sm:$0x1] %v3141_v54 }
0x1baa   : > { %3901 = shalt.err (!%p3898_p3)
}
0x1bab   : > { %s3902_s26 = scalar_lea.hbm %s4713_s20, 16  ;;  %s3906_s23 = scalar_lea.hbm %s4820_s24, 32 }
0x1bac   : > { %p3903_p4 = scmp.ne.s32.totalorder %s4713_s20, %s3902_s26  ;;  %p3907_p9 = scmp.lt.u32.totalorder %s4713_s20, %s4820_s24 }
0x1bad   : > { %p3908_p10 = scmp.lt.u32.totalorder %s3906_s23, %s3902_s26  ;;  %p3910_p12 = scmp.lt.u32.totalorder %s3902_s26, %s4713_s20 }
0x1bae   : > { %p3904_p7 = pnand %p3903_p4, %p4109_p5 }
0x1baf   : > { %p3909_p11 = por %p3908_p10, %p3907_p9 }
0x1bb0   : > { %p3905_p8 = pneg %p3904_p7 }
0x1bb1   : > { %p3911_p13 = por %p3910_p12, %p3909_p11 }
0x1bb3   : > { %p3912_p0 = pnand %p3911_p13, %p3905_p8 }
0x1bb5   : > { %3915 = shalt.err (!%p3912_p0)
}
0x1bb6   : > { %3781 = dma.vmem_to_hbm [thread:$0]  (%p4109_p5), %s4715_s18, 16, %s4713_s20, %s3146_s2  }
0x1bb7 PF: > { %s4821_s19 = sld [smem:[#allocation7_spill]]  ;;  %s4822_s1 = sld [smem:[#allocation5_spill]] }
0x1bbd   : > { %p3787_p1 = scmp.ge.s32.totalorder %s4821_s19, 2  ;;  %s3170_s27 = sand.u32 1, %s4822_s1  }
0x1bbe   : > { %s3171_s21 = scalar_lea.sflag [#allocation3], %s3170_s27 }
0x1bbf   : > { %p3784_p2 = pnand %p3787_p1, %p4113_p6 }
0x1bc1   : > { %3933 = dma.done.wait (!%p3784_p2), %s3171_s21, 16  }
0x1bc2   : > { %3935 = vsyncadd (!%p3784_p2), %s3171_s21, 4294967280  ;;  %s4824_s21 = sld [smem:[#allocation8_spill]]  ;;  %s4825_s26 = sld [smem:[#allocation6_spill]] }
0x1bc3   : > { %s4826_s20 = sld [smem:[#allocation9_spill]]  ;;  %s4827_s0 = smov %s3942_s30 }
0x1bc8   : > { %p29_p3 = scmp.ge.s32.totalorder %s4824_s21, 4   ;;  %s4828_s30 = smov %s4825_s26 }
0x1bca   :  { %31 = sbr.rel (!%p29_p3) target bundleno = 10 (0xa), region = 141 }
0x1bd1   :  { %3175 = vsyncpa [#allocation3], 1 }
0x1bd2   :  { %3177 = vsyncpa [#allocation3 + $0x1], 1 }

</bundles_post_ra>
